<compile_context>
chip_gen: v7x
topology: tpu7x:2x2x1
jax: 0.10.0
libtpu: 0.0.40
codegen_flags: <defaults>
</compile_context>

<pallas_src>
import functools

import jax
import jax.numpy as jnp
from jax.experimental import pallas as pl
from jax.experimental.pallas import tpu as pltpu


# ---------------------------------------------------------------------------
# Tiling helper
# ---------------------------------------------------------------------------

def _pick_tile(dim, cap, align):
    """Largest tile <= cap that is a multiple of `align` and evenly divides
    `dim`.  Returns the full dim if dim <= cap (full-extent blocks are always
    legal) or if no aligned divisor exists."""
    if dim <= cap:
        return dim
    t = (cap // align) * align
    while t >= align:
        if dim % t == 0:
            return t
        t -= align
    return dim


# ---------------------------------------------------------------------------
# Kernel: tiled linear (+ bias + optional activation) with f32 accumulator
# ---------------------------------------------------------------------------

def _linear_kernel(x_ref, w_ref, b_ref, o_ref, acc_ref, *, activation):
    @pl.when(pl.program_id(2) == 0)
    def _():
        acc_ref[...] = jnp.zeros_like(acc_ref)

    acc_ref[...] += jnp.dot(x_ref[...], w_ref[...],
                            preferred_element_type=jnp.float32)

    @pl.when(pl.program_id(2) == pl.num_programs(2) - 1)
    def _():
        y = acc_ref[...] + b_ref[...].astype(jnp.float32)
        if activation == "gelu":
            # TODO(synk): HF BERT default is erf-gelu; tanh approximation used here.
            y = 0.5 * y * (1.0 + jnp.tanh(0.7978845608028654 *
                                          (y + 0.044715 * y * y * y)))
        elif activation == "tanh":
            y = jnp.tanh(y)
        o_ref[...] = y.astype(o_ref.dtype)


def linear(x, w, b, activation="none", out_dtype=jnp.bfloat16):
    m, k = x.shape
    k2, n = w.shape
    assert k == k2
    tm = _pick_tile(m, 256, 16)
    tn = _pick_tile(n, 256, 128)
    tk = _pick_tile(k, 512, 128)
    grid = (m // tm, n // tn, k // tk)
    return pl.pallas_call(
        functools.partial(_linear_kernel, activation=activation),
        out_shape=jax.ShapeDtypeStruct((m, n), out_dtype),
        grid=grid,
        in_specs=[
            pl.BlockSpec((tm, tk), lambda i, j, kk: (i, kk)),
            pl.BlockSpec((tk, tn), lambda i, j, kk: (kk, j)),
            pl.BlockSpec((1, tn), lambda i, j, kk: (0, j)),
        ],
        out_specs=pl.BlockSpec((tm, tn), lambda i, j, kk: (i, j)),
        scratch_shapes=[pltpu.VMEM((tm, tn), jnp.float32)],
        compiler_params=pltpu.CompilerParams(
            dimension_semantics=("parallel", "parallel", "arbitrary")),
    )(x, w, b.reshape(1, n))


# ---------------------------------------------------------------------------
# Kernel: tiled linear + bias + residual + LayerNorm fused epilogue
# (output dim kept whole so the LN sees the full row)
# ---------------------------------------------------------------------------

def _linear_res_ln_kernel(x_ref, w_ref, b_ref, res_ref, g_ref, bb_ref,
                          o_ref, acc_ref, *, eps):
    @pl.when(pl.program_id(1) == 0)
    def _():
        acc_ref[...] = jnp.zeros_like(acc_ref)

    acc_ref[...] += jnp.dot(x_ref[...], w_ref[...],
                            preferred_element_type=jnp.float32)

    @pl.when(pl.program_id(1) == pl.num_programs(1) - 1)
    def _():
        y = (acc_ref[...] + b_ref[...].astype(jnp.float32)
             + res_ref[...].astype(jnp.float32))
        mu = jnp.mean(y, axis=-1, keepdims=True)
        yc = y - mu
        var = jnp.mean(yc * yc, axis=-1, keepdims=True)
        inv = jax.lax.rsqrt(var + eps)
        o_ref[...] = (yc * inv * g_ref[...].astype(jnp.float32)
                      + bb_ref[...].astype(jnp.float32)).astype(o_ref.dtype)


def linear_residual_layernorm(x, w, b, res, gamma, beta, eps=1e-12,
                              out_dtype=jnp.bfloat16):
    m, k = x.shape
    k2, n = w.shape
    assert k == k2
    tm = _pick_tile(m, 256, 16)
    tk = _pick_tile(k, 512, 128)
    grid = (m // tm, k // tk)
    return pl.pallas_call(
        functools.partial(_linear_res_ln_kernel, eps=eps),
        out_shape=jax.ShapeDtypeStruct((m, n), out_dtype),
        grid=grid,
        in_specs=[
            pl.BlockSpec((tm, tk), lambda i, kk: (i, kk)),
            pl.BlockSpec((tk, n), lambda i, kk: (kk, 0)),
            pl.BlockSpec((1, n), lambda i, kk: (0, 0)),
            pl.BlockSpec((tm, n), lambda i, kk: (i, 0)),
            pl.BlockSpec((1, n), lambda i, kk: (0, 0)),
            pl.BlockSpec((1, n), lambda i, kk: (0, 0)),
        ],
        out_specs=pl.BlockSpec((tm, n), lambda i, kk: (i, 0)),
        scratch_shapes=[pltpu.VMEM((tm, n), jnp.float32)],
        compiler_params=pltpu.CompilerParams(
            dimension_semantics=("parallel", "arbitrary")),
    )(x, w, b.reshape(1, n), res, gamma.reshape(1, n), beta.reshape(1, n))


# ---------------------------------------------------------------------------
# Kernel: residual-free LayerNorm (embedding LN)
# ---------------------------------------------------------------------------

def _layernorm_kernel(x_ref, g_ref, b_ref, o_ref, *, eps):
    x = x_ref[...].astype(jnp.float32)
    mu = jnp.mean(x, axis=-1, keepdims=True)
    xc = x - mu
    var = jnp.mean(xc * xc, axis=-1, keepdims=True)
    inv = jax.lax.rsqrt(var + eps)
    o_ref[...] = (xc * inv * g_ref[...] + b_ref[...]).astype(o_ref.dtype)


def layernorm(x, gamma, beta, eps=1e-12, out_dtype=jnp.bfloat16):
    m, h = x.shape
    tm = _pick_tile(m, 512, 16)
    grid = (m // tm,)
    return pl.pallas_call(
        functools.partial(_layernorm_kernel, eps=eps),
        out_shape=jax.ShapeDtypeStruct((m, h), out_dtype),
        grid=grid,
        in_specs=[
            pl.BlockSpec((tm, h), lambda i: (i, 0)),
            pl.BlockSpec((1, h), lambda i: (0, 0)),
            pl.BlockSpec((1, h), lambda i: (0, 0)),
        ],
        out_specs=pl.BlockSpec((tm, h), lambda i: (i, 0)),
        compiler_params=pltpu.CompilerParams(dimension_semantics=("parallel",)),
    )(x, gamma.reshape(1, h), beta.reshape(1, h))


# ---------------------------------------------------------------------------
# Kernel: multi-head self-attention, one batch element per grid step,
# heads unrolled in-kernel from the fused QKV block (no HBM head transposes).
# ---------------------------------------------------------------------------

def _attention_kernel(qkv_ref, bias_ref, o_ref, *, num_heads, head_dim, scale):
    qkv = qkv_ref[0]              # [S, 3H] bf16
    bias = bias_ref[0]            # [1, S]  f32 additive mask bias
    h_size = num_heads * head_dim
    outs = []
    for h in range(num_heads):
        off = h * head_dim
        q = qkv[:, off:off + head_dim]
        k = qkv[:, h_size + off:h_size + off + head_dim]
        v = qkv[:, 2 * h_size + off:2 * h_size + off + head_dim]
        # scores = q @ k^T  (contract the head_dim axes)
        s = jax.lax.dot_general(q, k, (((1,), (1,)), ((), ())),
                                preferred_element_type=jnp.float32)
        s = s * scale + bias
        s = s - jnp.max(s, axis=-1, keepdims=True)
        p = jnp.exp(s)
        denom = jnp.sum(p, axis=-1, keepdims=True)
        p = p * pl.reciprocal(denom, approx=True)
        o = jnp.dot(p.astype(v.dtype), v, preferred_element_type=jnp.float32)
        outs.append(o)
    o_ref[0] = jnp.concatenate(outs, axis=-1).astype(o_ref.dtype)


def attention(qkv, attn_bias, *, num_heads, head_dim):
    # TODO(synk): flash-style KV tiling (online softmax) for very long S.
    b, s, three_h = qkv.shape
    h = num_heads * head_dim
    scale = 1.0 / (head_dim ** 0.5)
    return pl.pallas_call(
        functools.partial(_attention_kernel, num_heads=num_heads,
                          head_dim=head_dim, scale=scale),
        out_shape=jax.ShapeDtypeStruct((b, s, h), jnp.bfloat16),
        grid=(b,),
        in_specs=[
            pl.BlockSpec((1, s, three_h), lambda i: (i, 0, 0)),
            pl.BlockSpec((1, 1, s), lambda i: (i, 0, 0)),
        ],
        out_specs=pl.BlockSpec((1, s, h), lambda i: (i, 0, 0)),
        compiler_params=pltpu.CompilerParams(dimension_semantics=("parallel",)),
    )(qkv, attn_bias)


# ---------------------------------------------------------------------------
# BERT forward (glue around the kernels)
# ---------------------------------------------------------------------------

def bert_encoder(params, input_ids, token_type_ids, attention_mask, *, num_heads):
    word_emb = params["word_emb"]
    pos_emb = params["pos_emb"]
    type_emb = params["type_emb"]
    B, S = input_ids.shape
    H = word_emb.shape[1]
    dH = H // num_heads

    # Embedding lookups are gathers -> plain JAX glue.
    positions = jnp.arange(S)
    emb = (word_emb[input_ids] + pos_emb[positions][None, :, :]
           + type_emb[token_type_ids])                           # [B, S, H] f32
    x = layernorm(emb.reshape(B * S, H), params["emb_ln_g"], params["emb_ln_b"])
    # TODO(synk): embedding / hidden / attention dropout omitted (eval-mode identity).

    # Additive mask bias precomputed once: [B, 1, S], 0 = keep, -10000 = mask.
    attn_bias = ((1.0 - attention_mask.astype(jnp.float32)) * (-10000.0)
                 ).reshape(B, 1, S)

    for layer in params["layers"]:
        qkv = linear(x, layer["w_qkv"], layer["b_qkv"])          # [B*S, 3H] bf16
        ctx = attention(qkv.reshape(B, S, 3 * H), attn_bias,
                        num_heads=num_heads, head_dim=dH)        # [B, S, H] bf16
        x = linear_residual_layernorm(ctx.reshape(B * S, H),
                                      layer["wo"], layer["bo"], x,
                                      layer["ln1_g"], layer["ln1_b"])
        ffn = linear(x, layer["w1"], layer["b1"], activation="gelu")
        x = linear_residual_layernorm(ffn, layer["w2"], layer["b2"], x,
                                      layer["ln2_g"], layer["ln2_b"])

    seq_out = x.reshape(B, S, H)                  # pade_outputs  [B, S, H]
    cls = seq_out[:, 0, :]                        # CLS token     [B, H]
    pooled = linear(cls, params["pool_w"], params["pool_b"],
                    activation="tanh", out_dtype=jnp.float32)
    return seq_out, pooled


def encoder_bert_forward(params, input_ids, token_type_ids, attention_mask, *, num_heads):
    """Mirrors Encoder_Bert.forward: (encoder_outputs [S,B,H], problem_output [B,H])."""
    pade_outputs, problem_output = bert_encoder(
        params, input_ids, token_type_ids, attention_mask, num_heads=num_heads)
    # self.em_dropout(problem_output): eval-mode identity.
    # TODO(synk): training-mode dropout (p=0.5) not implemented.
    encoder_outputs = jnp.transpose(pade_outputs, (1, 0, 2)).astype(jnp.float32)
    return encoder_outputs, problem_output


# ---------------------------------------------------------------------------
# Deterministic parameter init + prep (fused QKV, bf16 matmul weights)
# ---------------------------------------------------------------------------

def init_params(key, *, vocab_size, max_pos, type_vocab, hidden, intermediate, num_layers):
    keys = iter(jax.random.split(key, 16 + 16 * num_layers))
    nrm = lambda shape: (0.02 * jax.random.normal(next(keys), shape, jnp.float32))
    ones = lambda shape: jnp.ones(shape, jnp.float32)
    zeros = lambda shape: jnp.zeros(shape, jnp.float32)

    params = dict(
        word_emb=nrm((vocab_size, hidden)),
        pos_emb=nrm((max_pos, hidden)),
        type_emb=nrm((type_vocab, hidden)),
        emb_ln_g=ones((hidden,)),
        emb_ln_b=zeros((hidden,)),
        pool_w=nrm((hidden, hidden)),
        pool_b=zeros((hidden,)),
        layers=[],
    )
    for _ in range(num_layers):
        params["layers"].append(dict(
            wq=nrm((hidden, hidden)), bq=zeros((hidden,)),
            wk=nrm((hidden, hidden)), bk=zeros((hidden,)),
            wv=nrm((hidden, hidden)), bv=zeros((hidden,)),
            wo=nrm((hidden, hidden)), bo=zeros((hidden,)),
            ln1_g=ones((hidden,)), ln1_b=zeros((hidden,)),
            w1=nrm((hidden, intermediate)), b1=zeros((intermediate,)),
            w2=nrm((intermediate, hidden)), b2=zeros((hidden,)),
            ln2_g=ones((hidden,)), ln2_b=zeros((hidden,)),
        ))
    return params


def prepare_params(raw):
    """Fuse QKV weights and cast matmul weights to bf16 (MXU); biases/LN stay f32."""
    bf = lambda a: a.astype(jnp.bfloat16)
    p = dict(
        word_emb=raw["word_emb"], pos_emb=raw["pos_emb"], type_emb=raw["type_emb"],
        emb_ln_g=raw["emb_ln_g"], emb_ln_b=raw["emb_ln_b"],
        pool_w=bf(raw["pool_w"]), pool_b=raw["pool_b"],
        layers=[],
    )
    for l in raw["layers"]:
        p["layers"].append(dict(
            w_qkv=bf(jnp.concatenate([l["wq"], l["wk"], l["wv"]], axis=1)),
            b_qkv=jnp.concatenate([l["bq"], l["bk"], l["bv"]]),
            wo=bf(l["wo"]), bo=l["bo"],
            ln1_g=l["ln1_g"], ln1_b=l["ln1_b"],
            w1=bf(l["w1"]), b1=l["b1"],
            w2=bf(l["w2"]), b2=l["b2"],
            ln2_g=l["ln2_g"], ln2_b=l["ln2_b"],
        ))
    return p


if __name__ == "__main__":
    # Small synthetic BERT config.
    B, S = 2, 8
    HIDDEN, N_HEADS, INTER, N_LAYERS = 32, 4, 64, 2
    VOCAB, MAX_POS, TYPE_VOCAB = 100, 32, 2

    key = jax.random.PRNGKey(0)
    k_ids, k_params = jax.random.split(key, 2)

    input_ids = jax.random.randint(k_ids, (B, S), 0, VOCAB, dtype=jnp.int32)
    token_type_ids = jnp.zeros((B, S), jnp.int32)
    attention_mask = jnp.ones((B, S), jnp.int32).at[1, 6:].set(0)  # pad tail of row 1

    raw = init_params(k_params, vocab_size=VOCAB, max_pos=MAX_POS,
                      type_vocab=TYPE_VOCAB, hidden=HIDDEN,
                      intermediate=INTER, num_layers=N_LAYERS)
    params = prepare_params(raw)

    fwd = jax.jit(functools.partial(encoder_bert_forward, num_heads=N_HEADS))
    encoder_outputs, problem_output = fwd(params, input_ids, token_type_ids,
                                          attention_mask)
    jax.block_until_ready((encoder_outputs, problem_output))

    assert encoder_outputs.shape == (S, B, HIDDEN)
    assert problem_output.shape == (B, HIDDEN)
    assert bool(jnp.all(jnp.isfinite(encoder_outputs)))
    assert bool(jnp.all(jnp.isfinite(problem_output)))
    print("KERNEL_OK")
</pallas_src>

<mosaic_0001>
module attributes {stable_mosaic.version = 11 : i64} {
  func.func @_layernorm_kernel(%arg0: i32, %arg1: memref<16x32xf32, #tpu.memory_space<vmem>>, %arg2: memref<1x32xf32, #tpu.memory_space<vmem>>, %arg3: memref<1x32xf32, #tpu.memory_space<vmem>>, %arg4: memref<16x32xbf16, #tpu.memory_space<vmem>>) attributes {dimension_semantics = [#tpu.dimension_semantics<parallel>], iteration_bounds = array<i64: 1>, scalar_prefetch = 0 : i64, scratch_operands = 0 : i64, tpu.core_type = #tpu.core_type<tc>, window_params = [{transform_indices = @transform_0, window_bounds = array<i64: 16, 32>}, {pipeline_mode = #tpu.pipeline_mode<synchronous>, transform_indices = @transform_1, window_bounds = array<i64: 1, 32>}, {pipeline_mode = #tpu.pipeline_mode<synchronous>, transform_indices = @transform_2, window_bounds = array<i64: 1, 32>}, {transform_indices = @transform_3, window_bounds = array<i64: 16, 32>}]} {
    %c0 = arith.constant 0 : index
    %c0_0 = arith.constant 0 : index
    %0 = vector.load %arg1[%c0, %c0_0] : memref<16x32xf32, #tpu.memory_space<vmem>>, vector<16x32xf32>
    %cst = arith.constant dense<0.000000e+00> : vector<16xf32>
    %1 = vector.multi_reduction <add>, %0, %cst [1] : vector<16x32xf32> to vector<16xf32>
    %2 = vector.shape_cast %1 : vector<16xf32> to vector<16x1xf32>
    %cst_1 = arith.constant 3.200000e+01 : f32
    %3 = vector.broadcast %cst_1 : f32 to vector<16x1xf32>
    %4 = arith.divf %2, %3 : vector<16x1xf32>
    %5 = vector.broadcast %4 : vector<16x1xf32> to vector<16x32xf32>
    %6 = arith.subf %0, %5 : vector<16x32xf32>
    %7 = arith.mulf %6, %6 : vector<16x32xf32>
    %cst_2 = arith.constant dense<0.000000e+00> : vector<16xf32>
    %8 = vector.multi_reduction <add>, %7, %cst_2 [1] : vector<16x32xf32> to vector<16xf32>
    %9 = vector.shape_cast %8 : vector<16xf32> to vector<16x1xf32>
    %cst_3 = arith.constant 3.200000e+01 : f32
    %10 = vector.broadcast %cst_3 : f32 to vector<16x1xf32>
    %11 = arith.divf %9, %10 : vector<16x1xf32>
    %cst_4 = arith.constant 9.99999996E-13 : f32
    %12 = vector.broadcast %cst_4 : f32 to vector<16x1xf32>
    %13 = arith.addf %11, %12 : vector<16x1xf32>
    %14 = math.rsqrt %13 : vector<16x1xf32>
    %15 = vector.broadcast %14 : vector<16x1xf32> to vector<16x32xf32>
    %16 = arith.mulf %6, %15 : vector<16x32xf32>
    %c0_5 = arith.constant 0 : index
    %c0_6 = arith.constant 0 : index
    %17 = vector.load %arg2[%c0_5, %c0_6] : memref<1x32xf32, #tpu.memory_space<vmem>>, vector<1x32xf32>
    %18 = vector.broadcast %17 : vector<1x32xf32> to vector<16x32xf32>
    %19 = arith.mulf %16, %18 : vector<16x32xf32>
    %c0_7 = arith.constant 0 : index
    %c0_8 = arith.constant 0 : index
    %20 = vector.load %arg3[%c0_7, %c0_8] : memref<1x32xf32, #tpu.memory_space<vmem>>, vector<1x32xf32>
    %21 = vector.broadcast %20 : vector<1x32xf32> to vector<16x32xf32>
    %22 = arith.addf %19, %21 : vector<16x32xf32>
    %23 = arith.truncf %22 : vector<16x32xf32> to vector<16x32xbf16>
    %c0_9 = arith.constant 0 : index
    %c0_10 = arith.constant 0 : index
    %24 = vector.load %arg4[%c0_9, %c0_10] : memref<16x32xbf16, #tpu.memory_space<vmem>>, vector<16x32xbf16>
    tpu.vector_store %arg4[%c0_9, %c0_10], %23 {strides = array<i32>} : memref<16x32xbf16, #tpu.memory_space<vmem>>, vector<16x32xbf16>,
    return
  }
  func.func @transform_0(%arg0: i32) -> (i32, i32) {
    %c0_i32 = arith.constant 0 : i32
    %c0_i32_0 = arith.constant 0 : i32
    return %arg0, %c0_i32 : i32, i32
  }
  func.func @transform_1(%arg0: i32) -> (i32, i32) {
    %c0_i32 = arith.constant 0 : i32
    %c0_i32_0 = arith.constant 0 : i32
    %c0_i32_1 = arith.constant 0 : i32
    return %c0_i32, %c0_i32_0 : i32, i32
  }
  func.func @transform_2(%arg0: i32) -> (i32, i32) {
    %c0_i32 = arith.constant 0 : i32
    %c0_i32_0 = arith.constant 0 : i32
    %c0_i32_1 = arith.constant 0 : i32
    return %c0_i32, %c0_i32_0 : i32, i32
  }
  func.func @transform_3(%arg0: i32) -> (i32, i32) {
    %c0_i32 = arith.constant 0 : i32
    %c0_i32_0 = arith.constant 0 : i32
    return %arg0, %c0_i32 : i32, i32
  }
}

module attributes {stable_mosaic.version = 11 : i64} {
  func.func @_linear_kernel(%arg0: i32, %arg1: i32, %arg2: i32, %arg3: memref<16x32xbf16, #tpu.memory_space<vmem>>, %arg4: memref<32x96xbf16, #tpu.memory_space<vmem>>, %arg5: memref<1x96xf32, #tpu.memory_space<vmem>>, %arg6: memref<16x96xbf16, #tpu.memory_space<vmem>>, %arg7: memref<16x96xf32, #tpu.memory_space<vmem>>) attributes {dimension_semantics = [#tpu.dimension_semantics<parallel>, #tpu.dimension_semantics<parallel>, #tpu.dimension_semantics<arbitrary>], iteration_bounds = array<i64: 1, 1, 1>, scalar_prefetch = 0 : i64, scratch_operands = 1 : i64, tpu.core_type = #tpu.core_type<tc>, window_params = [{transform_indices = @transform_0, window_bounds = array<i64: 16, 32>}, {transform_indices = @transform_1, window_bounds = array<i64: 32, 96>}, {transform_indices = @transform_2, window_bounds = array<i64: 1, 96>}, {transform_indices = @transform_3, window_bounds = array<i64: 16, 96>}]} {
    %c0_i32 = arith.constant 0 : i32
    %0 = arith.cmpi eq, %arg2, %c0_i32 : i32
    %1 = arith.extui %0 : i1 to i32
    %c0_i32_0 = arith.constant 0 : i32
    %2 = arith.cmpi ne, %1, %c0_i32_0 : i32
    scf.if %2 {
      %cst_10 = arith.constant 0.000000e+00 : f32
      %12 = vector.broadcast %cst_10 : f32 to vector<16x96xf32>
      %c0_11 = arith.constant 0 : index
      %c0_12 = arith.constant 0 : index
      %13 = vector.load %arg7[%c0_11, %c0_12] : memref<16x96xf32, #tpu.memory_space<vmem>>, vector<16x96xf32>
      tpu.vector_store %arg7[%c0_11, %c0_12], %12 {strides = array<i32>} : memref<16x96xf32, #tpu.memory_space<vmem>>, vector<16x96xf32>,
    } else {
    }
    %c0 = arith.constant 0 : index
    %c0_1 = arith.constant 0 : index
    %3 = vector.load %arg7[%c0, %c0_1] : memref<16x96xf32, #tpu.memory_space<vmem>>, vector<16x96xf32>
    %c0_2 = arith.constant 0 : index
    %c0_3 = arith.constant 0 : index
    %4 = vector.load %arg3[%c0_2, %c0_3] : memref<16x32xbf16, #tpu.memory_space<vmem>>, vector<16x32xbf16>
    %c0_4 = arith.constant 0 : index
    %c0_5 = arith.constant 0 : index
    %5 = vector.load %arg4[%c0_4, %c0_5] : memref<32x96xbf16, #tpu.memory_space<vmem>>, vector<32x96xbf16>
    %cst = arith.constant dense<0.000000e+00> : vector<16x96xf32>
    %6 = tpu.matmul %4, %5, %cst {dimension_numbers = #tpu.dot_dimension_numbers<[1], [0], [0], [1], [0, 0, 1, 1], [], []>} : vector<16x32xbf16>, vector<32x96xbf16>, vector<16x96xf32> -> vector<16x96xf32>
    %7 = arith.addf %3, %6 : vector<16x96xf32>
    %c0_6 = arith.constant 0 : index
    %c0_7 = arith.constant 0 : index
    %8 = vector.load %arg7[%c0_6, %c0_7] : memref<16x96xf32, #tpu.memory_space<vmem>>, vector<16x96xf32>
    tpu.vector_store %arg7[%c0_6, %c0_7], %7 {strides = array<i32>} : memref<16x96xf32, #tpu.memory_space<vmem>>, vector<16x96xf32>,
    %c0_i32_8 = arith.constant 0 : i32
    %9 = arith.cmpi eq, %arg2, %c0_i32_8 : i32
    %10 = arith.extui %9 : i1 to i32
    %c0_i32_9 = arith.constant 0 : i32
    %11 = arith.cmpi ne, %10, %c0_i32_9 : i32
    scf.if %11 {
      %c0_10 = arith.constant 0 : index
      %c0_11 = arith.constant 0 : index
      %12 = vector.load %arg7[%c0_10, %c0_11] : memref<16x96xf32, #tpu.memory_space<vmem>>, vector<16x96xf32>
      %c0_12 = arith.constant 0 : index
      %c0_13 = arith.constant 0 : index
      %13 = vector.load %arg5[%c0_12, %c0_13] : memref<1x96xf32, #tpu.memory_space<vmem>>, vector<1x96xf32>
      %14 = vector.broadcast %13 : vector<1x96xf32> to vector<16x96xf32>
      %15 = arith.addf %12, %14 : vector<16x96xf32>
      %16 = arith.truncf %15 : vector<16x96xf32> to vector<16x96xbf16>
      %c0_14 = arith.constant 0 : index
      %c0_15 = arith.constant 0 : index
      %17 = vector.load %arg6[%c0_14, %c0_15] : memref<16x96xbf16, #tpu.memory_space<vmem>>, vector<16x96xbf16>
      tpu.vector_store %arg6[%c0_14, %c0_15], %16 {strides = array<i32>} : memref<16x96xbf16, #tpu.memory_space<vmem>>, vector<16x96xbf16>,
    } else {
    }
    return
  }
  func.func @transform_0(%arg0: i32, %arg1: i32, %arg2: i32) -> (i32, i32) {
    %c0_i32 = arith.constant 0 : i32
    return %arg0, %arg2 : i32, i32
  }
  func.func @transform_1(%arg0: i32, %arg1: i32, %arg2: i32) -> (i32, i32) {
    %c0_i32 = arith.constant 0 : i32
    return %arg2, %arg1 : i32, i32
  }
  func.func @transform_2(%arg0: i32, %arg1: i32, %arg2: i32) -> (i32, i32) {
    %c0_i32 = arith.constant 0 : i32
    %c0_i32_0 = arith.constant 0 : i32
    return %c0_i32, %arg1 : i32, i32
  }
  func.func @transform_3(%arg0: i32, %arg1: i32, %arg2: i32) -> (i32, i32) {
    %c0_i32 = arith.constant 0 : i32
    return %arg0, %arg1 : i32, i32
  }
}

module attributes {stable_mosaic.version = 11 : i64} {
  func.func @_attention_kernel(%arg0: i32, %arg1: memref<1x8x96xbf16, #tpu.memory_space<vmem>>, %arg2: memref<1x1x8xf32, #tpu.memory_space<vmem>>, %arg3: memref<1x8x32xbf16, #tpu.memory_space<vmem>>) attributes {dimension_semantics = [#tpu.dimension_semantics<parallel>], iteration_bounds = array<i64: 2>, scalar_prefetch = 0 : i64, scratch_operands = 0 : i64, tpu.core_type = #tpu.core_type<tc>, window_params = [{transform_indices = @transform_0, window_bounds = array<i64: 1, 8, 96>}, {transform_indices = @transform_1, window_bounds = array<i64: 1, 1, 8>}, {transform_indices = @transform_2, window_bounds = array<i64: 1, 8, 32>}]} {
    %c0 = arith.constant 0 : index
    %c0_0 = arith.constant 0 : index
    %c0_1 = arith.constant 0 : index
    %0 = vector.load %arg1[%c0, %c0_0, %c0_1] : memref<1x8x96xbf16, #tpu.memory_space<vmem>>, vector<1x8x96xbf16>
    %1 = vector.shape_cast %0 : vector<1x8x96xbf16> to vector<8x96xbf16>
    %c0_2 = arith.constant 0 : index
    %c0_3 = arith.constant 0 : index
    %c0_4 = arith.constant 0 : index
    %2 = vector.load %arg2[%c0_2, %c0_3, %c0_4] : memref<1x1x8xf32, #tpu.memory_space<vmem>>, vector<1x1x8xf32>
    %3 = vector.shape_cast %2 : vector<1x1x8xf32> to vector<1x8xf32>
    %4 = vector.extract_strided_slice %1 {offsets = [0, 0], sizes = [8, 8], strides = [1, 1]} : vector<8x96xbf16> to vector<8x8xbf16>
    %5 = vector.extract_strided_slice %1 {offsets = [0, 32], sizes = [8, 8], strides = [1, 1]} : vector<8x96xbf16> to vector<8x8xbf16>
    %6 = vector.extract_strided_slice %1 {offsets = [0, 64], sizes = [8, 8], strides = [1, 1]} : vector<8x96xbf16> to vector<8x8xbf16>
    %cst = arith.constant dense<0.000000e+00> : vector<8x8xf32>
    %7 = tpu.matmul %4, %5, %cst {dimension_numbers = #tpu.dot_dimension_numbers<[1], [1], [0], [0], [0, 0, 1, 0], [], []>} : vector<8x8xbf16>, vector<8x8xbf16>, vector<8x8xf32> -> vector<8x8xf32>
    %cst_5 = arith.constant 0.353553385 : f32
    %8 = vector.broadcast %cst_5 : f32 to vector<8x8xf32>
    %9 = arith.mulf %7, %8 : vector<8x8xf32>
    %10 = vector.broadcast %3 : vector<1x8xf32> to vector<8x8xf32>
    %11 = arith.addf %9, %10 : vector<8x8xf32>
    %cst_6 = arith.constant dense<0xFF800000> : vector<8xf32>
    %12 = vector.multi_reduction <maximumf>, %11, %cst_6 [1] : vector<8x8xf32> to vector<8xf32>
    %13 = vector.shape_cast %12 : vector<8xf32> to vector<8x1xf32>
    %14 = vector.broadcast %13 : vector<8x1xf32> to vector<8x8xf32>
    %15 = arith.subf %11, %14 : vector<8x8xf32>
    %16 = math.exp %15 : vector<8x8xf32>
    %cst_7 = arith.constant dense<0.000000e+00> : vector<8xf32>
    %17 = vector.multi_reduction <add>, %16, %cst_7 [1] : vector<8x8xf32> to vector<8xf32>
    %18 = vector.shape_cast %17 : vector<8xf32> to vector<8x1xf32>
    %19 = tpu.reciprocal %18 {approx = true} : vector<8x1xf32> -> vector<8x1xf32>
    %20 = vector.broadcast %19 : vector<8x1xf32> to vector<8x8xf32>
    %21 = arith.mulf %16, %20 : vector<8x8xf32>
    %22 = arith.truncf %21 : vector<8x8xf32> to vector<8x8xbf16>
    %cst_8 = arith.constant dense<0.000000e+00> : vector<8x8xf32>
    %23 = tpu.matmul %22, %6, %cst_8 {dimension_numbers = #tpu.dot_dimension_numbers<[1], [0], [0], [1], [0, 0, 1, 1], [], []>} : vector<8x8xbf16>, vector<8x8xbf16>, vector<8x8xf32> -> vector<8x8xf32>
    %24 = vector.extract_strided_slice %1 {offsets = [0, 8], sizes = [8, 8], strides = [1, 1]} : vector<8x96xbf16> to vector<8x8xbf16>
    %25 = vector.extract_strided_slice %1 {offsets = [0, 40], sizes = [8, 8], strides = [1, 1]} : vector<8x96xbf16> to vector<8x8xbf16>
    %26 = vector.extract_strided_slice %1 {offsets = [0, 72], sizes = [8, 8], strides = [1, 1]} : vector<8x96xbf16> to vector<8x8xbf16>
    %cst_9 = arith.constant dense<0.000000e+00> : vector<8x8xf32>
    %27 = tpu.matmul %24, %25, %cst_9 {dimension_numbers = #tpu.dot_dimension_numbers<[1], [1], [0], [0], [0, 0, 1, 0], [], []>} : vector<8x8xbf16>, vector<8x8xbf16>, vector<8x8xf32> -> vector<8x8xf32>
    %cst_10 = arith.constant 0.353553385 : f32
    %28 = vector.broadcast %cst_10 : f32 to vector<8x8xf32>
    %29 = arith.mulf %27, %28 : vector<8x8xf32>
    %30 = vector.broadcast %3 : vector<1x8xf32> to vector<8x8xf32>
    %31 = arith.addf %29, %30 : vector<8x8xf32>
    %cst_11 = arith.constant dense<0xFF800000> : vector<8xf32>
    %32 = vector.multi_reduction <maximumf>, %31, %cst_11 [1] : vector<8x8xf32> to vector<8xf32>
    %33 = vector.shape_cast %32 : vector<8xf32> to vector<8x1xf32>
    %34 = vector.broadcast %33 : vector<8x1xf32> to vector<8x8xf32>
    %35 = arith.subf %31, %34 : vector<8x8xf32>
    %36 = math.exp %35 : vector<8x8xf32>
    %cst_12 = arith.constant dense<0.000000e+00> : vector<8xf32>
    %37 = vector.multi_reduction <add>, %36, %cst_12 [1] : vector<8x8xf32> to vector<8xf32>
    %38 = vector.shape_cast %37 : vector<8xf32> to vector<8x1xf32>
    %39 = tpu.reciprocal %38 {approx = true} : vector<8x1xf32> -> vector<8x1xf32>
    %40 = vector.broadcast %39 : vector<8x1xf32> to vector<8x8xf32>
    %41 = arith.mulf %36, %40 : vector<8x8xf32>
    %42 = arith.truncf %41 : vector<8x8xf32> to vector<8x8xbf16>
    %cst_13 = arith.constant dense<0.000000e+00> : vector<8x8xf32>
    %43 = tpu.matmul %42, %26, %cst_13 {dimension_numbers = #tpu.dot_dimension_numbers<[1], [0], [0], [1], [0, 0, 1, 1], [], []>} : vector<8x8xbf16>, vector<8x8xbf16>, vector<8x8xf32> -> vector<8x8xf32>
    %44 = vector.extract_strided_slice %1 {offsets = [0, 16], sizes = [8, 8], strides = [1, 1]} : vector<8x96xbf16> to vector<8x8xbf16>
    %45 = vector.extract_strided_slice %1 {offsets = [0, 48], sizes = [8, 8], strides = [1, 1]} : vector<8x96xbf16> to vector<8x8xbf16>
    %46 = vector.extract_strided_slice %1 {offsets = [0, 80], sizes = [8, 8], strides = [1, 1]} : vector<8x96xbf16> to vector<8x8xbf16>
    %cst_14 = arith.constant dense<0.000000e+00> : vector<8x8xf32>
    %47 = tpu.matmul %44, %45, %cst_14 {dimension_numbers = #tpu.dot_dimension_numbers<[1], [1], [0], [0], [0, 0, 1, 0], [], []>} : vector<8x8xbf16>, vector<8x8xbf16>, vector<8x8xf32> -> vector<8x8xf32>
    %cst_15 = arith.constant 0.353553385 : f32
    %48 = vector.broadcast %cst_15 : f32 to vector<8x8xf32>
    %49 = arith.mulf %47, %48 : vector<8x8xf32>
    %50 = vector.broadcast %3 : vector<1x8xf32> to vector<8x8xf32>
    %51 = arith.addf %49, %50 : vector<8x8xf32>
    %cst_16 = arith.constant dense<0xFF800000> : vector<8xf32>
    %52 = vector.multi_reduction <maximumf>, %51, %cst_16 [1] : vector<8x8xf32> to vector<8xf32>
    %53 = vector.shape_cast %52 : vector<8xf32> to vector<8x1xf32>
    %54 = vector.broadcast %53 : vector<8x1xf32> to vector<8x8xf32>
    %55 = arith.subf %51, %54 : vector<8x8xf32>
    %56 = math.exp %55 : vector<8x8xf32>
    %cst_17 = arith.constant dense<0.000000e+00> : vector<8xf32>
    %57 = vector.multi_reduction <add>, %56, %cst_17 [1] : vector<8x8xf32> to vector<8xf32>
    %58 = vector.shape_cast %57 : vector<8xf32> to vector<8x1xf32>
    %59 = tpu.reciprocal %58 {approx = true} : vector<8x1xf32> -> vector<8x1xf32>
    %60 = vector.broadcast %59 : vector<8x1xf32> to vector<8x8xf32>
    %61 = arith.mulf %56, %60 : vector<8x8xf32>
    %62 = arith.truncf %61 : vector<8x8xf32> to vector<8x8xbf16>
    %cst_18 = arith.constant dense<0.000000e+00> : vector<8x8xf32>
    %63 = tpu.matmul %62, %46, %cst_18 {dimension_numbers = #tpu.dot_dimension_numbers<[1], [0], [0], [1], [0, 0, 1, 1], [], []>} : vector<8x8xbf16>, vector<8x8xbf16>, vector<8x8xf32> -> vector<8x8xf32>
    %64 = vector.extract_strided_slice %1 {offsets = [0, 24], sizes = [8, 8], strides = [1, 1]} : vector<8x96xbf16> to vector<8x8xbf16>
    %65 = vector.extract_strided_slice %1 {offsets = [0, 56], sizes = [8, 8], strides = [1, 1]} : vector<8x96xbf16> to vector<8x8xbf16>
    %66 = vector.extract_strided_slice %1 {offsets = [0, 88], sizes = [8, 8], strides = [1, 1]} : vector<8x96xbf16> to vector<8x8xbf16>
    %cst_19 = arith.constant dense<0.000000e+00> : vector<8x8xf32>
    %67 = tpu.matmul %64, %65, %cst_19 {dimension_numbers = #tpu.dot_dimension_numbers<[1], [1], [0], [0], [0, 0, 1, 0], [], []>} : vector<8x8xbf16>, vector<8x8xbf16>, vector<8x8xf32> -> vector<8x8xf32>
    %cst_20 = arith.constant 0.353553385 : f32
    %68 = vector.broadcast %cst_20 : f32 to vector<8x8xf32>
    %69 = arith.mulf %67, %68 : vector<8x8xf32>
    %70 = vector.broadcast %3 : vector<1x8xf32> to vector<8x8xf32>
    %71 = arith.addf %69, %70 : vector<8x8xf32>
    %cst_21 = arith.constant dense<0xFF800000> : vector<8xf32>
    %72 = vector.multi_reduction <maximumf>, %71, %cst_21 [1] : vector<8x8xf32> to vector<8xf32>
    %73 = vector.shape_cast %72 : vector<8xf32> to vector<8x1xf32>
    %74 = vector.broadcast %73 : vector<8x1xf32> to vector<8x8xf32>
    %75 = arith.subf %71, %74 : vector<8x8xf32>
    %76 = math.exp %75 : vector<8x8xf32>
    %cst_22 = arith.constant dense<0.000000e+00> : vector<8xf32>
    %77 = vector.multi_reduction <add>, %76, %cst_22 [1] : vector<8x8xf32> to vector<8xf32>
    %78 = vector.shape_cast %77 : vector<8xf32> to vector<8x1xf32>
    %79 = tpu.reciprocal %78 {approx = true} : vector<8x1xf32> -> vector<8x1xf32>
    %80 = vector.broadcast %79 : vector<8x1xf32> to vector<8x8xf32>
    %81 = arith.mulf %76, %80 : vector<8x8xf32>
    %82 = arith.truncf %81 : vector<8x8xf32> to vector<8x8xbf16>
    %cst_23 = arith.constant dense<0.000000e+00> : vector<8x8xf32>
    %83 = tpu.matmul %82, %66, %cst_23 {dimension_numbers = #tpu.dot_dimension_numbers<[1], [0], [0], [1], [0, 0, 1, 1], [], []>} : vector<8x8xbf16>, vector<8x8xbf16>, vector<8x8xf32> -> vector<8x8xf32>
    %84 = tpu.concatenate %23, %43, %63, %83 in 1 : vector<8x8xf32>, vector<8x8xf32>, vector<8x8xf32>, vector<8x8xf32> -> vector<8x32xf32>
    %85 = arith.truncf %84 : vector<8x32xf32> to vector<8x32xbf16>
    %c0_24 = arith.constant 0 : index
    %c0_25 = arith.constant 0 : index
    %c0_26 = arith.constant 0 : index
    %86 = vector.load %arg3[%c0_24, %c0_25, %c0_26] : memref<1x8x32xbf16, #tpu.memory_space<vmem>>, vector<1x8x32xbf16>
    %87 = vector.shape_cast %86 : vector<1x8x32xbf16> to vector<8x32xbf16>
    %88 = vector.shape_cast %85 : vector<8x32xbf16> to vector<1x8x32xbf16>
    tpu.vector_store %arg3[%c0_24, %c0_25, %c0_26], %88 {strides = array<i32>} : memref<1x8x32xbf16, #tpu.memory_space<vmem>>, vector<1x8x32xbf16>,
    return
  }
  func.func @transform_0(%arg0: i32) -> (i32, i32, i32) {
    %c0_i32 = arith.constant 0 : i32
    %c0_i32_0 = arith.constant 0 : i32
    %c0_i32_1 = arith.constant 0 : i32
    return %arg0, %c0_i32, %c0_i32_0 : i32, i32, i32
  }
  func.func @transform_1(%arg0: i32) -> (i32, i32, i32) {
    %c0_i32 = arith.constant 0 : i32
    %c0_i32_0 = arith.constant 0 : i32
    %c0_i32_1 = arith.constant 0 : i32
    return %arg0, %c0_i32, %c0_i32_0 : i32, i32, i32
  }
  func.func @transform_2(%arg0: i32) -> (i32, i32, i32) {
    %c0_i32 = arith.constant 0 : i32
    %c0_i32_0 = arith.constant 0 : i32
    %c0_i32_1 = arith.constant 0 : i32
    return %arg0, %c0_i32, %c0_i32_0 : i32, i32, i32
  }
}

module attributes {stable_mosaic.version = 11 : i64} {
  func.func @_linear_res_ln_kernel(%arg0: i32, %arg1: i32, %arg2: memref<16x32xbf16, #tpu.memory_space<vmem>>, %arg3: memref<32x32xbf16, #tpu.memory_space<vmem>>, %arg4: memref<1x32xf32, #tpu.memory_space<vmem>>, %arg5: memref<16x32xbf16, #tpu.memory_space<vmem>>, %arg6: memref<1x32xf32, #tpu.memory_space<vmem>>, %arg7: memref<1x32xf32, #tpu.memory_space<vmem>>, %arg8: memref<16x32xbf16, #tpu.memory_space<vmem>>, %arg9: memref<16x32xf32, #tpu.memory_space<vmem>>) attributes {dimension_semantics = [#tpu.dimension_semantics<parallel>, #tpu.dimension_semantics<arbitrary>], iteration_bounds = array<i64: 1, 1>, scalar_prefetch = 0 : i64, scratch_operands = 1 : i64, tpu.core_type = #tpu.core_type<tc>, window_params = [{transform_indices = @transform_0, window_bounds = array<i64: 16, 32>}, {transform_indices = @transform_1, window_bounds = array<i64: 32, 32>}, {pipeline_mode = #tpu.pipeline_mode<synchronous>, transform_indices = @transform_2, window_bounds = array<i64: 1, 32>}, {transform_indices = @transform_3, window_bounds = array<i64: 16, 32>}, {pipeline_mode = #tpu.pipeline_mode<synchronous>, transform_indices = @transform_4, window_bounds = array<i64: 1, 32>}, {pipeline_mode = #tpu.pipeline_mode<synchronous>, transform_indices = @transform_5, window_bounds = array<i64: 1, 32>}, {transform_indices = @transform_6, window_bounds = array<i64: 16, 32>}]} {
    %c0_i32 = arith.constant 0 : i32
    %0 = arith.cmpi eq, %arg1, %c0_i32 : i32
    %1 = arith.extui %0 : i1 to i32
    %c0_i32_0 = arith.constant 0 : i32
    %2 = arith.cmpi ne, %1, %c0_i32_0 : i32
    scf.if %2 {
      %cst_10 = arith.constant 0.000000e+00 : f32
      %12 = vector.broadcast %cst_10 : f32 to vector<16x32xf32>
      %c0_11 = arith.constant 0 : index
      %c0_12 = arith.constant 0 : index
      %13 = vector.load %arg9[%c0_11, %c0_12] : memref<16x32xf32, #tpu.memory_space<vmem>>, vector<16x32xf32>
      tpu.vector_store %arg9[%c0_11, %c0_12], %12 {strides = array<i32>} : memref<16x32xf32, #tpu.memory_space<vmem>>, vector<16x32xf32>,
    } else {
    }
    %c0 = arith.constant 0 : index
    %c0_1 = arith.constant 0 : index
    %3 = vector.load %arg9[%c0, %c0_1] : memref<16x32xf32, #tpu.memory_space<vmem>>, vector<16x32xf32>
    %c0_2 = arith.constant 0 : index
    %c0_3 = arith.constant 0 : index
    %4 = vector.load %arg2[%c0_2, %c0_3] : memref<16x32xbf16, #tpu.memory_space<vmem>>, vector<16x32xbf16>
    %c0_4 = arith.constant 0 : index
    %c0_5 = arith.constant 0 : index
    %5 = vector.load %arg3[%c0_4, %c0_5] : memref<32x32xbf16, #tpu.memory_space<vmem>>, vector<32x32xbf16>
    %cst = arith.constant dense<0.000000e+00> : vector<16x32xf32>
    %6 = tpu.matmul %4, %5, %cst {dimension_numbers = #tpu.dot_dimension_numbers<[1], [0], [0], [1], [0, 0, 1, 1], [], []>} : vector<16x32xbf16>, vector<32x32xbf16>, vector<16x32xf32> -> vector<16x32xf32>
    %7 = arith.addf %3, %6 : vector<16x32xf32>
    %c0_6 = arith.constant 0 : index
    %c0_7 = arith.constant 0 : index
    %8 = vector.load %arg9[%c0_6, %c0_7] : memref<16x32xf32, #tpu.memory_space<vmem>>, vector<16x32xf32>
    tpu.vector_store %arg9[%c0_6, %c0_7], %7 {strides = array<i32>} : memref<16x32xf32, #tpu.memory_space<vmem>>, vector<16x32xf32>,
    %c0_i32_8 = arith.constant 0 : i32
    %9 = arith.cmpi eq, %arg1, %c0_i32_8 : i32
    %10 = arith.extui %9 : i1 to i32
    %c0_i32_9 = arith.constant 0 : i32
    %11 = arith.cmpi ne, %10, %c0_i32_9 : i32
    scf.if %11 {
      %c0_10 = arith.constant 0 : index
      %c0_11 = arith.constant 0 : index
      %12 = vector.load %arg9[%c0_10, %c0_11] : memref<16x32xf32, #tpu.memory_space<vmem>>, vector<16x32xf32>
      %c0_12 = arith.constant 0 : index
      %c0_13 = arith.constant 0 : index
      %13 = vector.load %arg4[%c0_12, %c0_13] : memref<1x32xf32, #tpu.memory_space<vmem>>, vector<1x32xf32>
      %14 = vector.broadcast %13 : vector<1x32xf32> to vector<16x32xf32>
      %15 = arith.addf %12, %14 : vector<16x32xf32>
      %c0_14 = arith.constant 0 : index
      %c0_15 = arith.constant 0 : index
      %16 = vector.load %arg5[%c0_14, %c0_15] : memref<16x32xbf16, #tpu.memory_space<vmem>>, vector<16x32xbf16>
      %17 = arith.extf %16 : vector<16x32xbf16> to vector<16x32xf32>
      %18 = arith.addf %15, %17 : vector<16x32xf32>
      %cst_16 = arith.constant dense<0.000000e+00> : vector<16xf32>
      %19 = vector.multi_reduction <add>, %18, %cst_16 [1] : vector<16x32xf32> to vector<16xf32>
      %20 = vector.shape_cast %19 : vector<16xf32> to vector<16x1xf32>
      %cst_17 = arith.constant 3.200000e+01 : f32
      %21 = vector.broadcast %cst_17 : f32 to vector<16x1xf32>
      %22 = arith.divf %20, %21 : vector<16x1xf32>
      %23 = vector.broadcast %22 : vector<16x1xf32> to vector<16x32xf32>
      %24 = arith.subf %18, %23 : vector<16x32xf32>
      %25 = arith.mulf %24, %24 : vector<16x32xf32>
      %cst_18 = arith.constant dense<0.000000e+00> : vector<16xf32>
      %26 = vector.multi_reduction <add>, %25, %cst_18 [1] : vector<16x32xf32> to vector<16xf32>
      %27 = vector.shape_cast %26 : vector<16xf32> to vector<16x1xf32>
      %cst_19 = arith.constant 3.200000e+01 : f32
      %28 = vector.broadcast %cst_19 : f32 to vector<16x1xf32>
      %29 = arith.divf %27, %28 : vector<16x1xf32>
      %cst_20 = arith.constant 9.99999996E-13 : f32
      %30 = vector.broadcast %cst_20 : f32 to vector<16x1xf32>
      %31 = arith.addf %29, %30 : vector<16x1xf32>
      %32 = math.rsqrt %31 : vector<16x1xf32>
      %33 = vector.broadcast %32 : vector<16x1xf32> to vector<16x32xf32>
      %34 = arith.mulf %24, %33 : vector<16x32xf32>
      %c0_21 = arith.constant 0 : index
      %c0_22 = arith.constant 0 : index
      %35 = vector.load %arg6[%c0_21, %c0_22] : memref<1x32xf32, #tpu.memory_space<vmem>>, vector<1x32xf32>
      %36 = vector.broadcast %35 : vector<1x32xf32> to vector<16x32xf32>
      %37 = arith.mulf %34, %36 : vector<16x32xf32>
      %c0_23 = arith.constant 0 : index
      %c0_24 = arith.constant 0 : index
      %38 = vector.load %arg7[%c0_23, %c0_24] : memref<1x32xf32, #tpu.memory_space<vmem>>, vector<1x32xf32>
      %39 = vector.broadcast %38 : vector<1x32xf32> to vector<16x32xf32>
      %40 = arith.addf %37, %39 : vector<16x32xf32>
      %41 = arith.truncf %40 : vector<16x32xf32> to vector<16x32xbf16>
      %c0_25 = arith.constant 0 : index
      %c0_26 = arith.constant 0 : index
      %42 = vector.load %arg8[%c0_25, %c0_26] : memref<16x32xbf16, #tpu.memory_space<vmem>>, vector<16x32xbf16>
      tpu.vector_store %arg8[%c0_25, %c0_26], %41 {strides = array<i32>} : memref<16x32xbf16, #tpu.memory_space<vmem>>, vector<16x32xbf16>,
    } else {
    }
    return
  }
  func.func @transform_0(%arg0: i32, %arg1: i32) -> (i32, i32) {
    %c0_i32 = arith.constant 0 : i32
    return %arg0, %arg1 : i32, i32
  }
  func.func @transform_1(%arg0: i32, %arg1: i32) -> (i32, i32) {
    %c0_i32 = arith.constant 0 : i32
    %c0_i32_0 = arith.constant 0 : i32
    return %arg1, %c0_i32 : i32, i32
  }
  func.func @transform_2(%arg0: i32, %arg1: i32) -> (i32, i32) {
    %c0_i32 = arith.constant 0 : i32
    %c0_i32_0 = arith.constant 0 : i32
    %c0_i32_1 = arith.constant 0 : i32
    return %c0_i32, %c0_i32_0 : i32, i32
  }
  func.func @transform_3(%arg0: i32, %arg1: i32) -> (i32, i32) {
    %c0_i32 = arith.constant 0 : i32
    %c0_i32_0 = arith.constant 0 : i32
    return %arg0, %c0_i32 : i32, i32
  }
  func.func @transform_4(%arg0: i32, %arg1: i32) -> (i32, i32) {
    %c0_i32 = arith.constant 0 : i32
    %c0_i32_0 = arith.constant 0 : i32
    %c0_i32_1 = arith.constant 0 : i32
    return %c0_i32, %c0_i32_0 : i32, i32
  }
  func.func @transform_5(%arg0: i32, %arg1: i32) -> (i32, i32) {
    %c0_i32 = arith.constant 0 : i32
    %c0_i32_0 = arith.constant 0 : i32
    %c0_i32_1 = arith.constant 0 : i32
    return %c0_i32, %c0_i32_0 : i32, i32
  }
  func.func @transform_6(%arg0: i32, %arg1: i32) -> (i32, i32) {
    %c0_i32 = arith.constant 0 : i32
    %c0_i32_0 = arith.constant 0 : i32
    return %arg0, %c0_i32 : i32, i32
  }
}

module attributes {stable_mosaic.version = 11 : i64} {
  func.func @_linear_kernel(%arg0: i32, %arg1: i32, %arg2: i32, %arg3: memref<16x32xbf16, #tpu.memory_space<vmem>>, %arg4: memref<32x64xbf16, #tpu.memory_space<vmem>>, %arg5: memref<1x64xf32, #tpu.memory_space<vmem>>, %arg6: memref<16x64xbf16, #tpu.memory_space<vmem>>, %arg7: memref<16x64xf32, #tpu.memory_space<vmem>>) attributes {dimension_semantics = [#tpu.dimension_semantics<parallel>, #tpu.dimension_semantics<parallel>, #tpu.dimension_semantics<arbitrary>], iteration_bounds = array<i64: 1, 1, 1>, scalar_prefetch = 0 : i64, scratch_operands = 1 : i64, tpu.core_type = #tpu.core_type<tc>, window_params = [{transform_indices = @transform_0, window_bounds = array<i64: 16, 32>}, {transform_indices = @transform_1, window_bounds = array<i64: 32, 64>}, {transform_indices = @transform_2, window_bounds = array<i64: 1, 64>}, {transform_indices = @transform_3, window_bounds = array<i64: 16, 64>}]} {
    %c0_i32 = arith.constant 0 : i32
    %0 = arith.cmpi eq, %arg2, %c0_i32 : i32
    %1 = arith.extui %0 : i1 to i32
    %c0_i32_0 = arith.constant 0 : i32
    %2 = arith.cmpi ne, %1, %c0_i32_0 : i32
    scf.if %2 {
      %cst_10 = arith.constant 0.000000e+00 : f32
      %12 = vector.broadcast %cst_10 : f32 to vector<16x64xf32>
      %c0_11 = arith.constant 0 : index
      %c0_12 = arith.constant 0 : index
      %13 = vector.load %arg7[%c0_11, %c0_12] : memref<16x64xf32, #tpu.memory_space<vmem>>, vector<16x64xf32>
      tpu.vector_store %arg7[%c0_11, %c0_12], %12 {strides = array<i32>} : memref<16x64xf32, #tpu.memory_space<vmem>>, vector<16x64xf32>,
    } else {
    }
    %c0 = arith.constant 0 : index
    %c0_1 = arith.constant 0 : index
    %3 = vector.load %arg7[%c0, %c0_1] : memref<16x64xf32, #tpu.memory_space<vmem>>, vector<16x64xf32>
    %c0_2 = arith.constant 0 : index
    %c0_3 = arith.constant 0 : index
    %4 = vector.load %arg3[%c0_2, %c0_3] : memref<16x32xbf16, #tpu.memory_space<vmem>>, vector<16x32xbf16>
    %c0_4 = arith.constant 0 : index
    %c0_5 = arith.constant 0 : index
    %5 = vector.load %arg4[%c0_4, %c0_5] : memref<32x64xbf16, #tpu.memory_space<vmem>>, vector<32x64xbf16>
    %cst = arith.constant dense<0.000000e+00> : vector<16x64xf32>
    %6 = tpu.matmul %4, %5, %cst {dimension_numbers = #tpu.dot_dimension_numbers<[1], [0], [0], [1], [0, 0, 1, 1], [], []>} : vector<16x32xbf16>, vector<32x64xbf16>, vector<16x64xf32> -> vector<16x64xf32>
    %7 = arith.addf %3, %6 : vector<16x64xf32>
    %c0_6 = arith.constant 0 : index
    %c0_7 = arith.constant 0 : index
    %8 = vector.load %arg7[%c0_6, %c0_7] : memref<16x64xf32, #tpu.memory_space<vmem>>, vector<16x64xf32>
    tpu.vector_store %arg7[%c0_6, %c0_7], %7 {strides = array<i32>} : memref<16x64xf32, #tpu.memory_space<vmem>>, vector<16x64xf32>,
    %c0_i32_8 = arith.constant 0 : i32
    %9 = arith.cmpi eq, %arg2, %c0_i32_8 : i32
    %10 = arith.extui %9 : i1 to i32
    %c0_i32_9 = arith.constant 0 : i32
    %11 = arith.cmpi ne, %10, %c0_i32_9 : i32
    scf.if %11 {
      %c0_10 = arith.constant 0 : index
      %c0_11 = arith.constant 0 : index
      %12 = vector.load %arg7[%c0_10, %c0_11] : memref<16x64xf32, #tpu.memory_space<vmem>>, vector<16x64xf32>
      %c0_12 = arith.constant 0 : index
      %c0_13 = arith.constant 0 : index
      %13 = vector.load %arg5[%c0_12, %c0_13] : memref<1x64xf32, #tpu.memory_space<vmem>>, vector<1x64xf32>
      %14 = vector.broadcast %13 : vector<1x64xf32> to vector<16x64xf32>
      %15 = arith.addf %12, %14 : vector<16x64xf32>
      %cst_14 = arith.constant 5.000000e-01 : f32
      %16 = vector.broadcast %cst_14 : f32 to vector<16x64xf32>
      %17 = arith.mulf %16, %15 : vector<16x64xf32>
      %cst_15 = arith.constant 4.471500e-02 : f32
      %18 = vector.broadcast %cst_15 : f32 to vector<16x64xf32>
      %19 = arith.mulf %18, %15 : vector<16x64xf32>
      %20 = arith.mulf %19, %15 : vector<16x64xf32>
      %21 = arith.mulf %20, %15 : vector<16x64xf32>
      %22 = arith.addf %15, %21 : vector<16x64xf32>
      %cst_16 = arith.constant 0.797884583 : f32
      %23 = vector.broadcast %cst_16 : f32 to vector<16x64xf32>
      %24 = arith.mulf %23, %22 : vector<16x64xf32>
      %25 = math.tanh %24 : vector<16x64xf32>
      %cst_17 = arith.constant 1.000000e+00 : f32
      %26 = vector.broadcast %cst_17 : f32 to vector<16x64xf32>
      %27 = arith.addf %26, %25 : vector<16x64xf32>
      %28 = arith.mulf %17, %27 : vector<16x64xf32>
      %29 = arith.truncf %28 : vector<16x64xf32> to vector<16x64xbf16>
      %c0_18 = arith.constant 0 : index
      %c0_19 = arith.constant 0 : index
      %30 = vector.load %arg6[%c0_18, %c0_19] : memref<16x64xbf16, #tpu.memory_space<vmem>>, vector<16x64xbf16>
      tpu.vector_store %arg6[%c0_18, %c0_19], %29 {strides = array<i32>} : memref<16x64xbf16, #tpu.memory_space<vmem>>, vector<16x64xbf16>,
    } else {
    }
    return
  }
  func.func @transform_0(%arg0: i32, %arg1: i32, %arg2: i32) -> (i32, i32) {
    %c0_i32 = arith.constant 0 : i32
    return %arg0, %arg2 : i32, i32
  }
  func.func @transform_1(%arg0: i32, %arg1: i32, %arg2: i32) -> (i32, i32) {
    %c0_i32 = arith.constant 0 : i32
    return %arg2, %arg1 : i32, i32
  }
  func.func @transform_2(%arg0: i32, %arg1: i32, %arg2: i32) -> (i32, i32) {
    %c0_i32 = arith.constant 0 : i32
    %c0_i32_0 = arith.constant 0 : i32
    return %c0_i32, %arg1 : i32, i32
  }
  func.func @transform_3(%arg0: i32, %arg1: i32, %arg2: i32) -> (i32, i32) {
    %c0_i32 = arith.constant 0 : i32
    return %arg0, %arg1 : i32, i32
  }
}

module attributes {stable_mosaic.version = 11 : i64} {
  func.func @_linear_res_ln_kernel(%arg0: i32, %arg1: i32, %arg2: memref<16x64xbf16, #tpu.memory_space<vmem>>, %arg3: memref<64x32xbf16, #tpu.memory_space<vmem>>, %arg4: memref<1x32xf32, #tpu.memory_space<vmem>>, %arg5: memref<16x32xbf16, #tpu.memory_space<vmem>>, %arg6: memref<1x32xf32, #tpu.memory_space<vmem>>, %arg7: memref<1x32xf32, #tpu.memory_space<vmem>>, %arg8: memref<16x32xbf16, #tpu.memory_space<vmem>>, %arg9: memref<16x32xf32, #tpu.memory_space<vmem>>) attributes {dimension_semantics = [#tpu.dimension_semantics<parallel>, #tpu.dimension_semantics<arbitrary>], iteration_bounds = array<i64: 1, 1>, scalar_prefetch = 0 : i64, scratch_operands = 1 : i64, tpu.core_type = #tpu.core_type<tc>, window_params = [{transform_indices = @transform_0, window_bounds = array<i64: 16, 64>}, {transform_indices = @transform_1, window_bounds = array<i64: 64, 32>}, {pipeline_mode = #tpu.pipeline_mode<synchronous>, transform_indices = @transform_2, window_bounds = array<i64: 1, 32>}, {transform_indices = @transform_3, window_bounds = array<i64: 16, 32>}, {pipeline_mode = #tpu.pipeline_mode<synchronous>, transform_indices = @transform_4, window_bounds = array<i64: 1, 32>}, {pipeline_mode = #tpu.pipeline_mode<synchronous>, transform_indices = @transform_5, window_bounds = array<i64: 1, 32>}, {transform_indices = @transform_6, window_bounds = array<i64: 16, 32>}]} {
    %c0_i32 = arith.constant 0 : i32
    %0 = arith.cmpi eq, %arg1, %c0_i32 : i32
    %1 = arith.extui %0 : i1 to i32
    %c0_i32_0 = arith.constant 0 : i32
    %2 = arith.cmpi ne, %1, %c0_i32_0 : i32
    scf.if %2 {
      %cst_10 = arith.constant 0.000000e+00 : f32
      %12 = vector.broadcast %cst_10 : f32 to vector<16x32xf32>
      %c0_11 = arith.constant 0 : index
      %c0_12 = arith.constant 0 : index
      %13 = vector.load %arg9[%c0_11, %c0_12] : memref<16x32xf32, #tpu.memory_space<vmem>>, vector<16x32xf32>
      tpu.vector_store %arg9[%c0_11, %c0_12], %12 {strides = array<i32>} : memref<16x32xf32, #tpu.memory_space<vmem>>, vector<16x32xf32>,
    } else {
    }
    %c0 = arith.constant 0 : index
    %c0_1 = arith.constant 0 : index
    %3 = vector.load %arg9[%c0, %c0_1] : memref<16x32xf32, #tpu.memory_space<vmem>>, vector<16x32xf32>
    %c0_2 = arith.constant 0 : index
    %c0_3 = arith.constant 0 : index
    %4 = vector.load %arg2[%c0_2, %c0_3] : memref<16x64xbf16, #tpu.memory_space<vmem>>, vector<16x64xbf16>
    %c0_4 = arith.constant 0 : index
    %c0_5 = arith.constant 0 : index
    %5 = vector.load %arg3[%c0_4, %c0_5] : memref<64x32xbf16, #tpu.memory_space<vmem>>, vector<64x32xbf16>
    %cst = arith.constant dense<0.000000e+00> : vector<16x32xf32>
    %6 = tpu.matmul %4, %5, %cst {dimension_numbers = #tpu.dot_dimension_numbers<[1], [0], [0], [1], [0, 0, 1, 1], [], []>} : vector<16x64xbf16>, vector<64x32xbf16>, vector<16x32xf32> -> vector<16x32xf32>
    %7 = arith.addf %3, %6 : vector<16x32xf32>
    %c0_6 = arith.constant 0 : index
    %c0_7 = arith.constant 0 : index
    %8 = vector.load %arg9[%c0_6, %c0_7] : memref<16x32xf32, #tpu.memory_space<vmem>>, vector<16x32xf32>
    tpu.vector_store %arg9[%c0_6, %c0_7], %7 {strides = array<i32>} : memref<16x32xf32, #tpu.memory_space<vmem>>, vector<16x32xf32>,
    %c0_i32_8 = arith.constant 0 : i32
    %9 = arith.cmpi eq, %arg1, %c0_i32_8 : i32
    %10 = arith.extui %9 : i1 to i32
    %c0_i32_9 = arith.constant 0 : i32
    %11 = arith.cmpi ne, %10, %c0_i32_9 : i32
    scf.if %11 {
      %c0_10 = arith.constant 0 : index
      %c0_11 = arith.constant 0 : index
      %12 = vector.load %arg9[%c0_10, %c0_11] : memref<16x32xf32, #tpu.memory_space<vmem>>, vector<16x32xf32>
      %c0_12 = arith.constant 0 : index
      %c0_13 = arith.constant 0 : index
      %13 = vector.load %arg4[%c0_12, %c0_13] : memref<1x32xf32, #tpu.memory_space<vmem>>, vector<1x32xf32>
      %14 = vector.broadcast %13 : vector<1x32xf32> to vector<16x32xf32>
      %15 = arith.addf %12, %14 : vector<16x32xf32>
      %c0_14 = arith.constant 0 : index
      %c0_15 = arith.constant 0 : index
      %16 = vector.load %arg5[%c0_14, %c0_15] : memref<16x32xbf16, #tpu.memory_space<vmem>>, vector<16x32xbf16>
      %17 = arith.extf %16 : vector<16x32xbf16> to vector<16x32xf32>
      %18 = arith.addf %15, %17 : vector<16x32xf32>
      %cst_16 = arith.constant dense<0.000000e+00> : vector<16xf32>
      %19 = vector.multi_reduction <add>, %18, %cst_16 [1] : vector<16x32xf32> to vector<16xf32>
      %20 = vector.shape_cast %19 : vector<16xf32> to vector<16x1xf32>
      %cst_17 = arith.constant 3.200000e+01 : f32
      %21 = vector.broadcast %cst_17 : f32 to vector<16x1xf32>
      %22 = arith.divf %20, %21 : vector<16x1xf32>
      %23 = vector.broadcast %22 : vector<16x1xf32> to vector<16x32xf32>
      %24 = arith.subf %18, %23 : vector<16x32xf32>
      %25 = arith.mulf %24, %24 : vector<16x32xf32>
      %cst_18 = arith.constant dense<0.000000e+00> : vector<16xf32>
      %26 = vector.multi_reduction <add>, %25, %cst_18 [1] : vector<16x32xf32> to vector<16xf32>
      %27 = vector.shape_cast %26 : vector<16xf32> to vector<16x1xf32>
      %cst_19 = arith.constant 3.200000e+01 : f32
      %28 = vector.broadcast %cst_19 : f32 to vector<16x1xf32>
      %29 = arith.divf %27, %28 : vector<16x1xf32>
      %cst_20 = arith.constant 9.99999996E-13 : f32
      %30 = vector.broadcast %cst_20 : f32 to vector<16x1xf32>
      %31 = arith.addf %29, %30 : vector<16x1xf32>
      %32 = math.rsqrt %31 : vector<16x1xf32>
      %33 = vector.broadcast %32 : vector<16x1xf32> to vector<16x32xf32>
      %34 = arith.mulf %24, %33 : vector<16x32xf32>
      %c0_21 = arith.constant 0 : index
      %c0_22 = arith.constant 0 : index
      %35 = vector.load %arg6[%c0_21, %c0_22] : memref<1x32xf32, #tpu.memory_space<vmem>>, vector<1x32xf32>
      %36 = vector.broadcast %35 : vector<1x32xf32> to vector<16x32xf32>
      %37 = arith.mulf %34, %36 : vector<16x32xf32>
      %c0_23 = arith.constant 0 : index
      %c0_24 = arith.constant 0 : index
      %38 = vector.load %arg7[%c0_23, %c0_24] : memref<1x32xf32, #tpu.memory_space<vmem>>, vector<1x32xf32>
      %39 = vector.broadcast %38 : vector<1x32xf32> to vector<16x32xf32>
      %40 = arith.addf %37, %39 : vector<16x32xf32>
      %41 = arith.truncf %40 : vector<16x32xf32> to vector<16x32xbf16>
      %c0_25 = arith.constant 0 : index
      %c0_26 = arith.constant 0 : index
      %42 = vector.load %arg8[%c0_25, %c0_26] : memref<16x32xbf16, #tpu.memory_space<vmem>>, vector<16x32xbf16>
      tpu.vector_store %arg8[%c0_25, %c0_26], %41 {strides = array<i32>} : memref<16x32xbf16, #tpu.memory_space<vmem>>, vector<16x32xbf16>,
    } else {
    }
    return
  }
  func.func @transform_0(%arg0: i32, %arg1: i32) -> (i32, i32) {
    %c0_i32 = arith.constant 0 : i32
    return %arg0, %arg1 : i32, i32
  }
  func.func @transform_1(%arg0: i32, %arg1: i32) -> (i32, i32) {
    %c0_i32 = arith.constant 0 : i32
    %c0_i32_0 = arith.constant 0 : i32
    return %arg1, %c0_i32 : i32, i32
  }
  func.func @transform_2(%arg0: i32, %arg1: i32) -> (i32, i32) {
    %c0_i32 = arith.constant 0 : i32
    %c0_i32_0 = arith.constant 0 : i32
    %c0_i32_1 = arith.constant 0 : i32
    return %c0_i32, %c0_i32_0 : i32, i32
  }
  func.func @transform_3(%arg0: i32, %arg1: i32) -> (i32, i32) {
    %c0_i32 = arith.constant 0 : i32
    %c0_i32_0 = arith.constant 0 : i32
    return %arg0, %c0_i32 : i32, i32
  }
  func.func @transform_4(%arg0: i32, %arg1: i32) -> (i32, i32) {
    %c0_i32 = arith.constant 0 : i32
    %c0_i32_0 = arith.constant 0 : i32
    %c0_i32_1 = arith.constant 0 : i32
    return %c0_i32, %c0_i32_0 : i32, i32
  }
  func.func @transform_5(%arg0: i32, %arg1: i32) -> (i32, i32) {
    %c0_i32 = arith.constant 0 : i32
    %c0_i32_0 = arith.constant 0 : i32
    %c0_i32_1 = arith.constant 0 : i32
    return %c0_i32, %c0_i32_0 : i32, i32
  }
  func.func @transform_6(%arg0: i32, %arg1: i32) -> (i32, i32) {
    %c0_i32 = arith.constant 0 : i32
    %c0_i32_0 = arith.constant 0 : i32
    return %arg0, %c0_i32 : i32, i32
  }
}

module attributes {stable_mosaic.version = 11 : i64} {
  func.func @_linear_kernel(%arg0: i32, %arg1: i32, %arg2: i32, %arg3: memref<2x32xbf16, #tpu.memory_space<vmem>>, %arg4: memref<32x32xbf16, #tpu.memory_space<vmem>>, %arg5: memref<1x32xf32, #tpu.memory_space<vmem>>, %arg6: memref<2x32xf32, #tpu.memory_space<vmem>>, %arg7: memref<2x32xf32, #tpu.memory_space<vmem>>) attributes {dimension_semantics = [#tpu.dimension_semantics<parallel>, #tpu.dimension_semantics<parallel>, #tpu.dimension_semantics<arbitrary>], iteration_bounds = array<i64: 1, 1, 1>, scalar_prefetch = 0 : i64, scratch_operands = 1 : i64, tpu.core_type = #tpu.core_type<tc>, window_params = [{transform_indices = @transform_0, window_bounds = array<i64: 2, 32>}, {transform_indices = @transform_1, window_bounds = array<i64: 32, 32>}, {transform_indices = @transform_2, window_bounds = array<i64: 1, 32>}, {transform_indices = @transform_3, window_bounds = array<i64: 2, 32>}]} {
    %c0_i32 = arith.constant 0 : i32
    %0 = arith.cmpi eq, %arg2, %c0_i32 : i32
    %1 = arith.extui %0 : i1 to i32
    %c0_i32_0 = arith.constant 0 : i32
    %2 = arith.cmpi ne, %1, %c0_i32_0 : i32
    scf.if %2 {
      %cst_10 = arith.constant 0.000000e+00 : f32
      %12 = vector.broadcast %cst_10 : f32 to vector<2x32xf32>
      %c0_11 = arith.constant 0 : index
      %c0_12 = arith.constant 0 : index
      %13 = vector.load %arg7[%c0_11, %c0_12] : memref<2x32xf32, #tpu.memory_space<vmem>>, vector<2x32xf32>
      tpu.vector_store %arg7[%c0_11, %c0_12], %12 {strides = array<i32>} : memref<2x32xf32, #tpu.memory_space<vmem>>, vector<2x32xf32>,
    } else {
    }
    %c0 = arith.constant 0 : index
    %c0_1 = arith.constant 0 : index
    %3 = vector.load %arg7[%c0, %c0_1] : memref<2x32xf32, #tpu.memory_space<vmem>>, vector<2x32xf32>
    %c0_2 = arith.constant 0 : index
    %c0_3 = arith.constant 0 : index
    %4 = vector.load %arg3[%c0_2, %c0_3] : memref<2x32xbf16, #tpu.memory_space<vmem>>, vector<2x32xbf16>
    %c0_4 = arith.constant 0 : index
    %c0_5 = arith.constant 0 : index
    %5 = vector.load %arg4[%c0_4, %c0_5] : memref<32x32xbf16, #tpu.memory_space<vmem>>, vector<32x32xbf16>
    %cst = arith.constant dense<0.000000e+00> : vector<2x32xf32>
    %6 = tpu.matmul %4, %5, %cst {dimension_numbers = #tpu.dot_dimension_numbers<[1], [0], [0], [1], [0, 0, 1, 1], [], []>} : vector<2x32xbf16>, vector<32x32xbf16>, vector<2x32xf32> -> vector<2x32xf32>
    %7 = arith.addf %3, %6 : vector<2x32xf32>
    %c0_6 = arith.constant 0 : index
    %c0_7 = arith.constant 0 : index
    %8 = vector.load %arg7[%c0_6, %c0_7] : memref<2x32xf32, #tpu.memory_space<vmem>>, vector<2x32xf32>
    tpu.vector_store %arg7[%c0_6, %c0_7], %7 {strides = array<i32>} : memref<2x32xf32, #tpu.memory_space<vmem>>, vector<2x32xf32>,
    %c0_i32_8 = arith.constant 0 : i32
    %9 = arith.cmpi eq, %arg2, %c0_i32_8 : i32
    %10 = arith.extui %9 : i1 to i32
    %c0_i32_9 = arith.constant 0 : i32
    %11 = arith.cmpi ne, %10, %c0_i32_9 : i32
    scf.if %11 {
      %c0_10 = arith.constant 0 : index
      %c0_11 = arith.constant 0 : index
      %12 = vector.load %arg7[%c0_10, %c0_11] : memref<2x32xf32, #tpu.memory_space<vmem>>, vector<2x32xf32>
      %c0_12 = arith.constant 0 : index
      %c0_13 = arith.constant 0 : index
      %13 = vector.load %arg5[%c0_12, %c0_13] : memref<1x32xf32, #tpu.memory_space<vmem>>, vector<1x32xf32>
      %14 = vector.broadcast %13 : vector<1x32xf32> to vector<2x32xf32>
      %15 = arith.addf %12, %14 : vector<2x32xf32>
      %16 = math.tanh %15 : vector<2x32xf32>
      %c0_14 = arith.constant 0 : index
      %c0_15 = arith.constant 0 : index
      %17 = vector.load %arg6[%c0_14, %c0_15] : memref<2x32xf32, #tpu.memory_space<vmem>>, vector<2x32xf32>
      tpu.vector_store %arg6[%c0_14, %c0_15], %16 {strides = array<i32>} : memref<2x32xf32, #tpu.memory_space<vmem>>, vector<2x32xf32>,
    } else {
    }
    return
  }
  func.func @transform_0(%arg0: i32, %arg1: i32, %arg2: i32) -> (i32, i32) {
    %c0_i32 = arith.constant 0 : i32
    return %arg0, %arg2 : i32, i32
  }
  func.func @transform_1(%arg0: i32, %arg1: i32, %arg2: i32) -> (i32, i32) {
    %c0_i32 = arith.constant 0 : i32
    return %arg2, %arg1 : i32, i32
  }
  func.func @transform_2(%arg0: i32, %arg1: i32, %arg2: i32) -> (i32, i32) {
    %c0_i32 = arith.constant 0 : i32
    %c0_i32_0 = arith.constant 0 : i32
    return %c0_i32, %arg1 : i32, i32
  }
  func.func @transform_3(%arg0: i32, %arg1: i32, %arg2: i32) -> (i32, i32) {
    %c0_i32 = arith.constant 0 : i32
    return %arg0, %arg1 : i32, i32
  }
}

</mosaic_0001>

<bundles_post_ra>
// kernel: encoder_bert_forward.12
= control target key start
LH: loop header
LB: loop body
LE: loop exit
PB: predicated region body
PF: predicated region fallthrough
CT: control target
= control target key end

     0   :  { %vm16_vm0 = vcmask 261120   ;;  %vm70_vm1 = vcmask 257024   ;;  %s129_s0 = inlined_call_operand.vmem [shape: f32[16,32], index: 0, kind: input, shape index: {}]   ;;  %s130_s1 = inlined_call_operand.vmem [shape: f32[1,32], index: 1, kind: input, shape index: {}]   ;;  %s131_s2 = inlined_call_operand.vmem [shape: f32[1,32], index: 2, kind: input, shape index: {}]   ;;  %s132_s3 = inlined_call_operand.vmem [shape: bf16[16,32], index: 3, kind: output, shape index: {}]  }
   0x1   :  { %v14_v0 = vld [vmem:[%s129_s0] sm:$0xff]  ;;  %v15_v1 = vld [vmem:[%s129_s0 + $0x8] sm:$0xff] }
   0x2   :  { %v17_v2 = vsel %vm16_vm0, %v14_v0, 0.0  ;;  %v20_v3 = vsel %vm16_vm0, %v15_v1, 0.0  ;;  %v77_v21 = vld [vmem:[%s130_s1] ss:$0 sm:$0xff] }
   0x3   :  { %18 = vadd.xlane.f32.xlu0 %v17_v2  ;;  %v78_v23 = vld [vmem:[%s131_s2] ss:$0 sm:$0xff] }
   0x7   :  { %21 = vadd.xlane.f32.xlu0 %v20_v3 }
  0x90   :  { %v19_v4 = vpop.xlane.xlu0 %18 }
  0x91   :  { %v24_v5 = vmul.f32 0.03125, %v19_v4 }
  0x93   :  { %v26_v6 = vsub.f32 %v14_v0, %v24_v5 }
  0x94   :  { %v22_v7 = vpop.xlane.xlu0 %21 }
  0x95   :  { %v25_v8 = vmul.f32 0.03125, %v22_v7  ;;  %v28_v9 = vmul.f32 %v26_v6, %v26_v6 }
  0x97   :  { %v27_v10 = vsub.f32 %v15_v1, %v25_v8  ;;  %v30_v11 = vsel %vm16_vm0, %v28_v9, 0.0 }
  0x98   :  { %31 = vadd.xlane.f32.xlu1 %v30_v11 }
  0x99   :  { %v29_v12 = vmul.f32 %v27_v10, %v27_v10 }
  0x9b   :  { %v33_v13 = vsel %vm16_vm0, %v29_v12, 0.0 }
  0x9c   :  { %34 = vadd.xlane.f32.xlu1 %v33_v13 }
 0x125   :  { %v32_v14 = vpop.xlane.xlu1 %31 }
 0x126   :  { %v36_v15 = vmul.f32 0.03125, %v32_v14 }
 0x128   :  { %v38_v16 = vadd.f32 1e-12, %v36_v15 }
 0x129   :  { %v35_v17 = vpop.xlane.xlu1 %34 }
 0x12a   :  { %83 = vrsqrt.f32 %v38_v16  ;;  %v37_v18 = vmul.f32 0.03125, %v35_v17 }
 0x12c   :  { %v39_v19 = vadd.f32 1e-12, %v37_v18 }
 0x12e   :  { %85 = vrsqrt.f32 %v39_v19 }
 0x134   :  { %v84_v20 = vpop.eup %83 }
 0x135   :  { %v42_v22 = vmul.f32 %v84_v20, %v26_v6 }
 0x137   :  { %v51_v24 = vmul.f32 %v77_v21, %v42_v22 }
 0x138   :  { %v86_v25 = vpop.eup %85 }
 0x139   :  { %v60_v26 = vadd.f32 %v78_v23, %v51_v24  ;;  %v43_v27 = vmul.f32 %v86_v25, %v27_v10 }
 0x13b   :  { %v81_v28 = vpack.c.bf16 %v60_v26, %v60_v26  ;;  %v52_v29 = vmul.f32 %v77_v21, %v43_v27 }
 0x13d   :  { %71 = vst.msk [vmem:[%s132_s3] sm:$0xf] %vm70_vm1, %v81_v28  ;;  %v61_v30 = vadd.f32 %v78_v23, %v52_v29 }
 0x13f   :  { %v82_v31 = vpack.c.bf16 %v61_v30, %v61_v30 }
 0x141   :  { %72 = vst.msk [vmem:[%s132_s3 + $0x4] sm:$0xf] %vm70_vm1, %v82_v31 }

// kernel: encoder_bert_forward.13
= control target key start
LH: loop header
LB: loop body
LE: loop exit
PB: predicated region body
PF: predicated region fallthrough
CT: control target
= control target key end

     0   :  { %vm19_vm0 = vcmask 785408   ;;  %v151_v0 = vmov 0.0   ;;  %vm152_vm1 = vmmov 0   ;;  %vm47_vm2 = vcmask 261120   ;;  %s195_s1 = inlined_call_operand.vmem [shape: bf16[32,96], index: 1, kind: input, shape index: {}]   ;;  %s196_s0 = inlined_call_operand.vmem [shape: bf16[16,32], index: 0, kind: input, shape index: {}]   ;;  %s197_s2 = inlined_call_operand.vmem [shape: f32[1,96], index: 2, kind: input, shape index: {}]   ;;  %s198_s3 = inlined_call_operand.vmem [shape: bf16[16,96], index: 3, kind: output, shape index: {}]  }
   0x1   :  { %138 = vmatprep.subr.bf16.mxu0 %v151_v0  ;;  %v148_v1 = vld [vmem:[%s195_s1] sm:$0xff]   ;;  %142 = vmatprep.mubr.msk.bf16.mxu0 %vm152_vm1, %v151_v0  ;;  %20 = vst.msk [vmem:[#allocation2] sm:$0xff] %vm19_vm0, %v151_v0  ;;  %21 = vst.msk [vmem:[#allocation2 + $0x8] sm:$0xff] %vm19_vm0, %v151_v0  ;;  %v149_v2 = vld [vmem:[%s195_s1 + $0x8] sm:$0xff]   ;;  %vm119_vm3 = vcmask 781312  }
   0x2   :  { %139 = vmatpush3.bf16.msra.mxu0 %v148_v1  ;;  %v150_v3 = vld [vmem:[%s196_s0] sm:$0xff]  }
   0x3   :  { %140 = vmatprep.subr.bf16.mxu0 %v151_v0  ;;  %v130_v12 = vld [vmem:[%s197_s2] ss:$0 sm:$0xff] }
   0x6   :  { %141 = vmatpush3.bf16.msra.mxu0 %v149_v2 }
   0x8   :  { %v22_v4 = vld [vmem:[#allocation2] sm:$0xff]  ;;  %v23_v6 = vld [vmem:[#allocation2 + $0x8] sm:$0xff] }
   0x9   :  { %143 = vmatmul.mubr.msk.bf16.vlgmr.msra.gmra.mrb[0].mxu0 %vm47_vm2, %v150_v3 }
  0xdc   :  { %v85_v5 = vpop.f32.mrb[0].mxu0 }
  0xdd   :  { %v92_v7 = vadd.f32 %v85_v5, %v22_v4  ;;  %v144_v8 = vpop.f32.mrb[1].mxu0 }
  0xde   :  { %v88_v9 = vpop.f32.mrb[2].mxu0 }
  0xdf   :  { %95 = vst.msk [vmem:[#allocation2] sm:$0xff] %vm19_vm0, %v92_v7  ;;  %v93_v10 = vadd.f32 %v88_v9, %v23_v6  ;;  %v145_v11 = vpop.f32.mrb[3].mxu0 }
  0xe1   :  { %96 = vst.msk [vmem:[#allocation2 + $0x8] sm:$0xff] %vm19_vm0, %v93_v10 }
  0xe6   :  { %v100_v13 = vld [vmem:[#allocation2] sm:$0xff] }
  0xe7   :  { %v109_v14 = vadd.f32 %v130_v12, %v100_v13 }
  0xe8   :  { %v101_v15 = vld [vmem:[#allocation2 + $0x8] sm:$0xff] }
  0xe9   :  { %v133_v16 = vpack.c.bf16 %v109_v14, %v109_v14  ;;  %v110_v17 = vadd.f32 %v130_v12, %v101_v15 }
  0xeb   :  { %120 = vst.msk [vmem:[%s198_s3] sm:$0xf] %vm119_vm3, %v133_v16  ;;  %v134_v18 = vpack.c.bf16 %v110_v17, %v110_v17 }
  0xed   :  { %121 = vst.msk [vmem:[%s198_s3 + $0x4] sm:$0xf] %vm119_vm3, %v134_v18 }

// kernel: encoder_bert_forward.15
= control target key start
LH: loop header
LB: loop body
LE: loop exit
PB: predicated region body
PF: predicated region fallthrough
CT: control target
= control target key end

     0   :  { %vm28_vm0 = vcmask 261120   ;;  %v220_v0 = vmov 0.0   ;;  %vm221_vm1 = vmmov 0   ;;  %vm178_vm2 = vcmask 257024   ;;  %s293_s1 = inlined_call_operand.vmem [shape: bf16[32,32], index: 1, kind: input, shape index: {}]   ;;  %s294_s0 = inlined_call_operand.vmem [shape: bf16[16,32], index: 0, kind: input, shape index: {}]   ;;  %s295_s3 = inlined_call_operand.vmem [shape: bf16[16,32], index: 3, kind: input, shape index: {}]   ;;  %s296_s2 = inlined_call_operand.vmem [shape: f32[1,32], index: 2, kind: input, shape index: {}]   ;;  %s297_s4 = inlined_call_operand.vmem [shape: f32[1,32], index: 4, kind: input, shape index: {}]   ;;  %s298_s5 = inlined_call_operand.vmem [shape: f32[1,32], index: 5, kind: input, shape index: {}]   ;;  %s299_s6 = inlined_call_operand.vmem [shape: bf16[16,32], index: 6, kind: output, shape index: {}]  }
   0x1   :  { %203 = vmatprep.subr.bf16.mxu0 %v220_v0  ;;  %v213_v1 = vld [vmem:[%s293_s1] sm:$0xff]   ;;  %207 = vmatprep.mubr.msk.bf16.mxu0 %vm221_vm1, %v220_v0  ;;  %29 = vst.msk [vmem:[#allocation2] sm:$0xff] %vm28_vm0, %v220_v0  ;;  %30 = vst.msk [vmem:[#allocation2 + $0x8] sm:$0xff] %vm28_vm0, %v220_v0  ;;  %v214_v2 = vld [vmem:[%s293_s1 + $0x8] sm:$0xff]  }
   0x2   :  { %204 = vmatpush3.bf16.msra.mxu0 %v213_v1  ;;  %v215_v3 = vld [vmem:[%s294_s0] sm:$0xff]  }
   0x3   :  { %205 = vmatprep.subr.bf16.mxu0 %v220_v0  ;;  %v197_v12 = vld [vmem:[%s295_s3] sm:$0xff]  }
   0x4   :  { %v189_v13 = vld [vmem:[%s296_s2] ss:$0 sm:$0xff]  ;;  %v198_v14 = vunpack.c.l.bf16 %v197_v12  ;;  %v199_v17 = vunpack.c.h.bf16 %v197_v12 }
   0x5   :  { %v190_v41 = vld [vmem:[%s297_s4] ss:$0 sm:$0xff] }
   0x6   :  { %206 = vmatpush3.bf16.msra.mxu0 %v214_v2  ;;  %v191_v43 = vld [vmem:[%s298_s5] ss:$0 sm:$0xff] }
   0x8   :  { %v31_v4 = vld [vmem:[#allocation2] sm:$0xff]  ;;  %v32_v6 = vld [vmem:[#allocation2 + $0x8] sm:$0xff] }
   0x9   :  { %208 = vmatmul.mubr.msk.bf16.vlgmr.msra.gmra.mrb[0].mxu0 %vm28_vm0, %v215_v3 }
  0xdc   :  { %v94_v5 = vpop.f32.mrb[0].mxu0 }
  0xdd   :  { %v101_v7 = vadd.f32 %v94_v5, %v31_v4  ;;  %v209_v8 = vpop.f32.mrb[1].mxu0 }
  0xde   :  { %v97_v9 = vpop.f32.mrb[2].mxu0 }
  0xdf   :  { %103 = vst.msk [vmem:[#allocation2] sm:$0xff] %vm28_vm0, %v101_v7  ;;  %v102_v10 = vadd.f32 %v97_v9, %v32_v6  ;;  %v210_v11 = vpop.f32.mrb[3].mxu0 }
  0xe1   :  { %104 = vst.msk [vmem:[#allocation2 + $0x8] sm:$0xff] %vm28_vm0, %v102_v10 }
  0xe6   :  { %v108_v15 = vld [vmem:[#allocation2] sm:$0xff] }
  0xe7   :  { %v117_v16 = vadd.f32 %v189_v13, %v108_v15 }
  0xe8   :  { %v109_v18 = vld [vmem:[#allocation2 + $0x8] sm:$0xff] }
  0xe9   :  { %v123_v19 = vadd.f32 %v198_v14, %v117_v16  ;;  %v118_v20 = vadd.f32 %v189_v13, %v109_v18 }
  0xeb   :  { %v125_v21 = vsel %vm28_vm0, %v123_v19, 0.0  ;;  %v124_v22 = vadd.f32 %v199_v17, %v118_v20 }
  0xec   :  { %126 = vadd.xlane.f32.xlu0 %v125_v21 }
  0xed   :  { %v128_v23 = vsel %vm28_vm0, %v124_v22, 0.0 }
  0xf0   :  { %129 = vadd.xlane.f32.xlu0 %v128_v23 }
 0x179   :  { %v127_v24 = vpop.xlane.xlu0 %126 }
 0x17a   :  { %v132_v25 = vmul.f32 0.03125, %v127_v24 }
 0x17c   :  { %v134_v26 = vsub.f32 %v123_v19, %v132_v25 }
 0x17d   :  { %v130_v27 = vpop.xlane.xlu0 %129 }
 0x17e   :  { %v133_v28 = vmul.f32 0.03125, %v130_v27  ;;  %v136_v29 = vmul.f32 %v134_v26, %v134_v26 }
 0x180   :  { %v135_v30 = vsub.f32 %v124_v22, %v133_v28  ;;  %v138_v31 = vsel %vm28_vm0, %v136_v29, 0.0 }
 0x181   :  { %139 = vadd.xlane.f32.xlu1 %v138_v31 }
 0x182   :  { %v137_v32 = vmul.f32 %v135_v30, %v135_v30 }
 0x184   :  { %v141_v33 = vsel %vm28_vm0, %v137_v32, 0.0 }
 0x185   :  { %142 = vadd.xlane.f32.xlu1 %v141_v33 }
 0x20e   :  { %v140_v34 = vpop.xlane.xlu1 %139 }
 0x20f   :  { %v144_v35 = vmul.f32 0.03125, %v140_v34 }
 0x211   :  { %v146_v36 = vadd.f32 1e-12, %v144_v35 }
 0x212   :  { %v143_v37 = vpop.xlane.xlu1 %142 }
 0x213   :  { %216 = vrsqrt.f32 %v146_v36  ;;  %v145_v38 = vmul.f32 0.03125, %v143_v37 }
 0x215   :  { %v147_v39 = vadd.f32 1e-12, %v145_v38 }
 0x217   :  { %218 = vrsqrt.f32 %v147_v39 }
 0x21d   :  { %v217_v40 = vpop.eup %216 }
 0x21e   :  { %v150_v42 = vmul.f32 %v217_v40, %v134_v26 }
 0x220   :  { %v159_v44 = vmul.f32 %v190_v41, %v150_v42 }
 0x221   :  { %v219_v45 = vpop.eup %218 }
 0x222   :  { %v168_v46 = vadd.f32 %v191_v43, %v159_v44  ;;  %v151_v47 = vmul.f32 %v219_v45, %v135_v30 }
 0x224   :  { %v194_v48 = vpack.c.bf16 %v168_v46, %v168_v46  ;;  %v160_v49 = vmul.f32 %v190_v41, %v151_v47 }
 0x226   :  { %179 = vst.msk [vmem:[%s299_s6] sm:$0xf] %vm178_vm2, %v194_v48  ;;  %v169_v50 = vadd.f32 %v191_v43, %v160_v49 }
 0x228   :  { %v195_v51 = vpack.c.bf16 %v169_v50, %v169_v50 }
 0x22a   :  { %180 = vst.msk [vmem:[%s299_s6 + $0x4] sm:$0xf] %vm178_vm2, %v195_v51 }

// kernel: encoder_bert_forward.14
= control target key start
LH: loop header
LB: loop body
LE: loop exit
PB: predicated region body
PF: predicated region fallthrough
CT: control target
= control target key end

     0   :  { %s858_s9 = smov 0   ;;  %s957_s0 = inlined_call_operand.vmem [shape: bf16[2,8,96], index: 0, kind: input, shape index: {}]   ;;  %s958_s1 = inlined_call_operand.vmem [shape: f32[2,1,8], index: 1, kind: input, shape index: {}]   ;;  %s959_s2 = inlined_call_operand.vmem [shape: bf16[2,8,32], index: 2, kind: output, shape index: {}]  }
   0x1 LB: > { %s695_s10 = sadd.s32 4294967295, %s825_s9   ;;  %p699_p0 = scmp.ge.s32.totalorder %s825_s9, 1  ;;  %s825_s9 = sphi %s858_s9, %s12_s9  }
   0x2   : > { %p119_p1 = scmp.lt.s32.totalorder %s825_s9, 3 }
   0x4   : > { %p120_p2 = pnand %p699_p0, %p119_p1 }
   0x5   : > { %p142_p3 = scmp.lt.s32.totalorder (!%p120_p2), %s695_s10, 1  ;;  %v827_v0 = vmov (!%p120_p2), 0.0   ;;  %vm828_vm0 = vmmov (!%p120_p2), 0   ;;  %s829_s15 = smov (!%p120_p2), 96   ;;  %vm161_vm1 = vcmask (!%p120_p2), 64512   ;;  %vm233_vm2 = vcmask (!%p120_p2), 1043456  }
   0x6   : > { %123 = sbr.rel (%p120_p2) target bundleno = 1606 (0x646), region = 28  ;;  %730 = vmatprep.subr.bf16.mxu0 (!%p120_p2), %v827_v0  ;;  %732 = vmatprep.mubr.msk.bf16.mxu0 (!%p120_p2), %vm828_vm0, %v827_v0  ;;  %s830_s16 = smov (!%p120_p2), 64   ;;  %vm626_vm3 = vcmask (!%p120_p2), 130048   ;;  %vm628_vm4 = vcmask (!%p120_p2), 195584   ;;  %vm631_vm5 = vcmask (!%p120_p2), 257024  }
   0x7   : > { %736 = vmatprep.subr.bf16.mxu1 (!%p120_p2), %v827_v0  ;;  %738 = vmatprep.mubr.msk.bf16.mxu1 (!%p120_p2), %vm828_vm0, %v827_v0  ;;  %s831_s17 = smov (!%p120_p2), 88   ;;  %s832_s21 = smov (!%p120_p2), 72  }
   0x8   : > { %s833_s22 = smov (!%p120_p2), 120   ;;  %s834_s23 = smov (!%p120_p2), 80  }
   0x9   : > { %s835_s24 = smov (!%p120_p2), 112   ;;  %s836_s25 = smov (!%p120_p2), 104  }
   0xa   : > { %s837_s26 = smov (!%p120_p2), 56   ;;  %s838_s27 = smov (!%p120_p2), 48  }
   0xb   : > { %s839_s28 = smov (!%p120_p2), 40   ;;  %s840_s29 = smov (!%p120_p2), 8  }
   0xc   : > { %s841_s30 = smov (!%p120_p2), 16   ;;  %s842_s3 = smov (!%p120_p2), 24  }
   0xd   : > { %s961_s10 = smov (!%p142_p3, %s695_s10), 1 }
   0xe   : > { %s700_s11 = sshll.u32 %s961_s10, 2  ;;  %s148_s20 = scalar_lea.vmem %s958_s1, %s961_s10 }
   0xf   : > { %s145_s14 = scalar_lea.vmem %s957_s0, %s700_s11  ;;  %v894_v6 = vld [vmem:[%s148_s20] ss:$0 sm:$0xff]  ;;  %s152_s6 = scalar_lea.vmem %s959_s2, %s700_s11 }
  0x10   : > { %v154_v1 = vld [vmem:[%s145_s14] sm:$0xf] }
  0x11   : > { %v880_v2 = vcombine.low %v154_v1, %v154_v1 }
  0x13   : > { %159 = vrot.lane.b32.xlu0 %v880_v2, %s829_s15  ;;  %228 = vrot.lane.b32.xlu1 %v880_v2, %s830_s16 }
  0x17   : > { %279 = vrot.lane.b32.xlu1 %v880_v2, %s831_s17 }
  0x85   : > { %v160_v3 = vpop.permute.xlu0 %159  ;;  %v229_v13 = vpop.permute.xlu1 %228 }
  0x86   : > { %v166_v4 = vsel %vm161_vm1, %v160_v3, 0  ;;  %v235_v14 = vsel %vm233_vm2, %v229_v13, 0 }
  0x87   : > { %731 = vmatpush3.bf16.xpose.msra.mxu0 %v166_v4  ;;  %737 = vmatpush3.bf16.msra.mxu1 %v235_v14 }
  0x88   : > { %748 = vmatprep.subr.bf16.mxu0 %v827_v0  ;;  %742 = vmatprep.subr.bf16.mxu1 %v827_v0 }
  0x89   : > { %v280_v20 = vpop.permute.xlu1 %279 }
  0x8a   : > { %v285_v26 = vsel %vm161_vm1, %v280_v20, 0 }
  0x8e   : > { %733 = vmatmul.mubr.msk.bf16.vlgmr.msra.gmra.mrb[0].mxu0 %vm161_vm1, %v154_v1 }
  0x8f   : > { %750 = vmatprep.mubr.msk.bf16.mxu0 %vm828_vm0, %v827_v0 }
 0x161   : > { %v202_v5 = vpop.f32.mrb[0].mxu0 }
 0x162   : > { %v208_v7 = vmul.f32 0.35355338, %v202_v5  ;;  %v734_v8 = vpop.f32.mrb[1].mxu0 }
 0x163   : > { %v205_v9 = vpop.f32.mrb[2].mxu0 }
 0x164   : > { %v735_v10 = vpop.f32.mrb[3].mxu0  ;;  %v215_v11 = vadd.f32 %v894_v6, %v208_v7 }
 0x166   : > { %v216_v12 = vsel %vm161_vm1, %v215_v11, -inf }
 0x167   : > { %217 = vmax.xlane.f32.xlu0 %v216_v12 }
 0x17d   : > { %503 = vrot.lane.b32.xlu0 %v880_v2, %s832_s21 }
 0x1f4   : > { %v218_v15 = vpop.xlane.xlu0 %217 }
 0x1f5   : > { %v219_v16 = vsub.f32 %v215_v11, %v218_v15 }
 0x1f7   : > { %v220_v17 = vmul.f32 1.442695, %v219_v16 }
 0x1f8   : > { %v504_v29 = vpop.permute.xlu0 %503 }
 0x1f9   : > { %803 = vpow2.f32 %v220_v17  ;;  %v509_v31 = vsel %vm161_vm1, %v504_v29, 0 }
 0x203   : > { %v804_v18 = vpop.eup %803 }
 0x204   : > { %v222_v19 = vsel %vm161_vm1, %v804_v18, 0.0 }
 0x205   : > { %223 = vadd.xlane.f32.xlu1 %v222_v19 }
 0x216   : > { %277 = vrot.lane.b32.xlu1 %v880_v2, %s833_s22 }
 0x21a   : > { %391 = vrot.lane.b32.xlu1 %v880_v2, %s834_s23 }
 0x21e   : > { %389 = vrot.lane.b32.xlu1 %v880_v2, %s835_s24 }
 0x222   : > { %501 = vrot.lane.b32.xlu1 %v880_v2, %s836_s25 }
 0x292   : > { %v224_v21 = vpop.xlane.xlu1 %223 }
 0x293   : > { %805 = vrcp.f32 %v224_v21 }
 0x296   : > { %v278_v24 = vpop.permute.xlu1 %277 }
 0x29a   : > { %v392_v27 = vpop.permute.xlu1 %391 }
 0x29b   : > { %v397_v28 = vsel %vm161_vm1, %v392_v27, 0 }
 0x29d   : > { %v806_v22 = vpop.eup %805 }
 0x29e   : > { %v226_v23 = vmul.f32 %v806_v22, %v804_v18  ;;  %v390_v30 = vpop.permute.xlu1 %389 }
 0x2a0   : > { %v227_v25 = vpack.c.bf16 %v226_v23, %v226_v23 }
 0x2a2   : > { %739 = vmatmul.mubr.msk.bf16.vlgmr.msra.gmra.mrb[0].mxu1 %vm161_vm1, %v227_v25  ;;  %v502_v32 = vpop.permute.xlu1 %501 }
 0x2a3   : > { %743 = vmatpush3.bf16.xpose.msra.mxu1 %v285_v26  ;;  %744 = vmatprep.mubr.msk.bf16.mxu1 %vm828_vm0, %v827_v0 }
 0x2a4   : > { %754 = vmatprep.subr.bf16.mxu1 %v827_v0 }
 0x2aa   : > { %745 = vmatmul.mubr.msk.bf16.vlgmr.msra.gmra.mrb[4].mxu1 %vm161_vm1, %v278_v24 }
 0x2ab   : > { %755 = vmatpush3.bf16.xpose.msra.mxu1 %v397_v28  ;;  %756 = vmatprep.mubr.msk.bf16.mxu1 %vm828_vm0, %v827_v0 }
 0x2ac   : > { %766 = vmatprep.subr.bf16.mxu1 %v827_v0 }
 0x2b2   : > { %757 = vmatmul.mubr.msk.bf16.vlgmr.msra.gmra.mrb[8].mxu1 %vm161_vm1, %v390_v30 }
 0x2b3   : > { %767 = vmatpush3.bf16.xpose.msra.mxu1 %v509_v31  ;;  %768 = vmatprep.mubr.msk.bf16.mxu1 %vm828_vm0, %v827_v0 }
 0x2ba   : > { %769 = vmatmul.mubr.msk.bf16.vlgmr.msra.gmra.mrb[12].mxu1 %vm161_vm1, %v502_v32 }
 0x375   : > { %v921_v33 = vpop.f32.mrb[0].mxu1 }
 0x376   : > { %v740_v34 = vpop.f32.mrb[1].mxu1 }
 0x377   : > { %v274_v35 = vpop.f32.mrb[2].mxu1 }
 0x378   : > { %v741_v36 = vpop.f32.mrb[3].mxu1 }
 0x37d   : > { %v321_v37 = vpop.f32.mrb[4].mxu1 }
 0x37e   : > { %v327_v38 = vmul.f32 0.35355338, %v321_v37  ;;  %v746_v39 = vpop.f32.mrb[5].mxu1 }
 0x37f   : > { %v324_v40 = vpop.f32.mrb[6].mxu1 }
 0x380   : > { %v747_v41 = vpop.f32.mrb[7].mxu1  ;;  %v328_v42 = vadd.f32 %v894_v6, %v327_v38 }
 0x382   : > { %v329_v43 = vsel %vm161_vm1, %v328_v42, -inf }
 0x383   : > { %330 = vmax.xlane.f32.xlu1 %v329_v43 }
 0x385   : > { %v433_v44 = vpop.f32.mrb[8].mxu1 }
 0x386   : > { %v439_v45 = vmul.f32 0.35355338, %v433_v44  ;;  %v758_v46 = vpop.f32.mrb[9].mxu1 }
 0x387   : > { %v436_v47 = vpop.f32.mrb[10].mxu1 }
 0x388   : > { %v440_v48 = vadd.f32 %v894_v6, %v439_v45  ;;  %v759_v49 = vpop.f32.mrb[11].mxu1 }
 0x38a   : > { %v441_v50 = vsel %vm161_vm1, %v440_v48, -inf }
 0x38b   : > { %442 = vmax.xlane.f32.xlu0 %v441_v50 }
 0x38d   : > { %v545_v51 = vpop.f32.mrb[12].mxu1 }
 0x38e   : > { %v551_v52 = vmul.f32 0.35355338, %v545_v51  ;;  %v770_v53 = vpop.f32.mrb[13].mxu1 }
 0x38f   : > { %v548_v54 = vpop.f32.mrb[14].mxu1 }
 0x390   : > { %v552_v55 = vadd.f32 %v894_v6, %v551_v52  ;;  %v771_v56 = vpop.f32.mrb[15].mxu1 }
 0x392   : > { %v553_v57 = vsel %vm161_vm1, %v552_v55, -inf }
 0x393   : > { %554 = vmax.xlane.f32.xlu1 %v553_v57 }
 0x410   : > { %v331_v58 = vpop.xlane.xlu1 %330 }
 0x411   : > { %v332_v59 = vsub.f32 %v328_v42, %v331_v58 }
 0x413   : > { %v333_v60 = vmul.f32 1.442695, %v332_v59 }
 0x415   : > { %807 = vpow2.f32 %v333_v60 }
 0x418   : > { %v443_v6 = vpop.xlane.xlu0 %442 }
 0x419   : > { %v444_v7 = vsub.f32 %v440_v48, %v443_v6 }
 0x41b   : > { %v445_v8 = vmul.f32 1.442695, %v444_v7 }
 0x41f   : > { %v808_v61 = vpop.eup %807 }
 0x420   : > { %v555_v62 = vpop.xlane.xlu1 %554  ;;  %v335_v63 = vsel %vm161_vm1, %v808_v61, 0.0 }
 0x421   : > { %v556_v1 = vsub.f32 %v552_v55, %v555_v62  ;;  %336 = vadd.xlane.f32.xlu1 %v335_v63 }
 0x423   : > { %v557_v3 = vmul.f32 1.442695, %v556_v1 }
 0x425   : > { %809 = vpow2.f32 %v557_v3 }
 0x426   : > { %811 = vpow2.f32 %v445_v8 }
 0x42f   : > { %v810_v4 = vpop.eup %809 }
 0x430   : > { %v559_v5 = vsel %vm161_vm1, %v810_v4, 0.0  ;;  %v812_v9 = vpop.eup %811 }
 0x431   : > { %560 = vadd.xlane.f32.xlu0 %v559_v5  ;;  %v447_v10 = vsel %vm161_vm1, %v812_v9, 0.0 }
 0x432   : > { %341 = vrot.lane.b32.xlu1 %v880_v2, %s837_s26 }
 0x447   : > { %453 = vrot.lane.b32.xlu0 %v880_v2, %s838_s27 }
 0x456   : > { %448 = vadd.xlane.f32.xlu1 %v447_v10 }
 0x467   : > { %565 = vrot.lane.b32.xlu1 %v880_v2, %s839_s28 }
 0x4ae   : > { %v337_v11 = vpop.xlane.xlu1 %336 }
 0x4af   : > { %813 = vrcp.f32 %v337_v11 }
 0x4b2   : > { %v342_v12 = vpop.permute.xlu1 %341 }
 0x4b3   : > { %v347_v13 = vsel %vm233_vm2, %v342_v12, 0 }
 0x4b4   : > { %749 = vmatpush3.bf16.msra.mxu0 %v347_v13 }
 0x4b5   : > { %760 = vmatprep.subr.bf16.mxu0 %v827_v0 }
 0x4b9   : > { %v814_v14 = vpop.eup %813 }
 0x4ba   : > { %v339_v15 = vmul.f32 %v814_v14, %v808_v61 }
 0x4bc   : > { %v340_v16 = vpack.c.bf16 %v339_v15, %v339_v15 }
 0x4be   : > { %751 = vmatmul.mubr.msk.bf16.vlgmr.msra.gmra.mrb[4].mxu0 %vm161_vm1, %v340_v16  ;;  %v561_v17 = vpop.xlane.xlu0 %560 }
 0x4bf   : > { %762 = vmatprep.mubr.msk.bf16.mxu0 %vm828_vm0, %v827_v0 }
 0x4c2   : > { %v454_v18 = vpop.permute.xlu0 %453 }
 0x4c3   : > { %v459_v2 = vsel %vm233_vm2, %v454_v18, 0 }
 0x4c4   : > { %761 = vmatpush3.bf16.msra.mxu0 %v459_v2 }
 0x4c5   : > { %772 = vmatprep.subr.bf16.mxu0 %v827_v0 }
 0x4e3   : > { %v449_v19 = vpop.xlane.xlu1 %448 }
 0x4e4   : > { %815 = vrcp.f32 %v449_v19 }
 0x4e5   : > { %817 = vrcp.f32 %v561_v17 }
 0x4e7   : > { %v566_v21 = vpop.permute.xlu1 %565 }
 0x4e8   : > { %v571_v23 = vsel %vm233_vm2, %v566_v21, 0 }
 0x4ee   : > { %v816_v20 = vpop.eup %815 }
 0x4ef   : > { %v451_v22 = vmul.f32 %v816_v20, %v812_v9  ;;  %v818_v25 = vpop.eup %817 }
 0x4f0   : > { %v563_v26 = vmul.f32 %v818_v25, %v810_v4 }
 0x4f1   : > { %v452_v24 = vpack.c.bf16 %v451_v22, %v451_v22 }
 0x4f2   : > { %v564_v27 = vpack.c.bf16 %v563_v26, %v563_v26 }
 0x4f3   : > { %763 = vmatmul.mubr.msk.bf16.vlgmr.msra.gmra.mrb[8].mxu0 %vm161_vm1, %v452_v24 }
 0x4f4   : > { %773 = vmatpush3.bf16.msra.mxu0 %v571_v23  ;;  %774 = vmatprep.mubr.msk.bf16.mxu0 %vm828_vm0, %v827_v0 }
 0x4fb   : > { %775 = vmatmul.mubr.msk.bf16.vlgmr.msra.gmra.mrb[12].mxu0 %vm161_vm1, %v564_v27 }
 0x591   : > { %v383_v28 = vpop.f32.mrb[4].mxu0 }
 0x592   : > { %614 = vrot.lane.b32.xlu1 %v383_v28, %s840_s29  ;;  %v752_v29 = vpop.f32.mrb[5].mxu0 }
 0x593   : > { %v386_v30 = vpop.f32.mrb[6].mxu0 }
 0x594   : > { %v753_v31 = vpop.f32.mrb[7].mxu0 }
 0x5c6   : > { %v495_v32 = vpop.f32.mrb[8].mxu0 }
 0x5c7   : > { %618 = vrot.lane.b32.xlu0 %v495_v32, %s841_s30  ;;  %v764_v34 = vpop.f32.mrb[9].mxu0 }
 0x5c8   : > { %v498_v35 = vpop.f32.mrb[10].mxu0 }
 0x5c9   : > { %v765_v36 = vpop.f32.mrb[11].mxu0 }
 0x5ce   : > { %v607_v37 = vpop.f32.mrb[12].mxu0 }
 0x5cf   : > { %622 = vrot.lane.b32.xlu1 %v607_v37, %s842_s3  ;;  %v776_v0 = vpop.f32.mrb[13].mxu0 }
 0x5d0   : > { %v610_v38 = vpop.f32.mrb[14].mxu0 }
 0x5d1   : > { %v777_v39 = vpop.f32.mrb[15].mxu0 }
 0x604   : > { %v615_v40 = vpop.permute.xlu1 %614 }
 0x605   : > { %v625_v42 = vsel %vm161_vm1, %v921_v33, %v615_v40 }
 0x639   : > { %v619_v41 = vpop.permute.xlu0 %618 }
 0x63a   : > { %v627_v43 = vsel %vm626_vm3, %v625_v42, %v619_v41 }
 0x641   : > { %v623_v44 = vpop.permute.xlu1 %622 }
 0x642   : > { %v629_v45 = vsel %vm628_vm4, %v627_v43, %v623_v44 }
 0x643   : > { %v630_v46 = vpack.c.bf16 %v629_v45, %v629_v45 }
 0x645   : > { %632 = vst.msk [vmem:[%s152_s6] sm:$0xf] %vm631_vm5, %v630_v46 }
 0x646 PF: > { %s12_s9 = sadd.s32 1, %s825_s9  }
 0x647   : > { %p9_p4 = scmp.ge.s32.totalorder %s12_s9, 4  }
 0x649   :  { %11 = sbr.rel (!%p9_p4) target bundleno = 1 (0x1), region = 61 }

// kernel: encoder_bert_forward.16
= control target key start
LH: loop header
LB: loop body
LE: loop exit
PB: predicated region body
PF: predicated region fallthrough
CT: control target
= control target key end

     0   :  { %vm19_vm0 = vcmask 523264   ;;  %v173_v0 = vmov 0.0   ;;  %vm174_vm1 = vmmov 0   ;;  %vm47_vm2 = vcmask 261120   ;;  %s217_s1 = inlined_call_operand.vmem [shape: bf16[32,64], index: 1, kind: input, shape index: {}]   ;;  %s218_s0 = inlined_call_operand.vmem [shape: bf16[16,32], index: 0, kind: input, shape index: {}]   ;;  %s219_s2 = inlined_call_operand.vmem [shape: f32[1,64], index: 2, kind: input, shape index: {}]   ;;  %s220_s3 = inlined_call_operand.vmem [shape: bf16[16,64], index: 3, kind: output, shape index: {}]  }
   0x1   :  { %156 = vmatprep.subr.bf16.mxu0 %v173_v0  ;;  %v166_v1 = vld [vmem:[%s217_s1] sm:$0xff]   ;;  %160 = vmatprep.mubr.msk.bf16.mxu0 %vm174_vm1, %v173_v0  ;;  %20 = vst.msk [vmem:[#allocation2] sm:$0xff] %vm19_vm0, %v173_v0  ;;  %21 = vst.msk [vmem:[#allocation2 + $0x8] sm:$0xff] %vm19_vm0, %v173_v0  ;;  %v167_v2 = vld [vmem:[%s217_s1 + $0x8] sm:$0xff]   ;;  %vm137_vm3 = vcmask 519168  }
   0x2   :  { %157 = vmatpush3.bf16.msra.mxu0 %v166_v1  ;;  %v168_v3 = vld [vmem:[%s218_s0] sm:$0xff]  }
   0x3   :  { %158 = vmatprep.subr.bf16.mxu0 %v173_v0  ;;  %v148_v12 = vld [vmem:[%s219_s2] ss:$0 sm:$0xff] }
   0x6   :  { %159 = vmatpush3.bf16.msra.mxu0 %v167_v2 }
   0x8   :  { %v22_v4 = vld [vmem:[#allocation2] sm:$0xff]  ;;  %v23_v6 = vld [vmem:[#allocation2 + $0x8] sm:$0xff] }
   0x9   :  { %161 = vmatmul.mubr.msk.bf16.vlgmr.msra.gmra.mrb[0].mxu0 %vm47_vm2, %v168_v3 }
  0xdc   :  { %v85_v5 = vpop.f32.mrb[0].mxu0 }
  0xdd   :  { %v92_v7 = vadd.f32 %v85_v5, %v22_v4  ;;  %v162_v8 = vpop.f32.mrb[1].mxu0 }
  0xde   :  { %v88_v9 = vpop.f32.mrb[2].mxu0 }
  0xdf   :  { %95 = vst.msk [vmem:[#allocation2] sm:$0xff] %vm19_vm0, %v92_v7  ;;  %v93_v10 = vadd.f32 %v88_v9, %v23_v6  ;;  %v163_v11 = vpop.f32.mrb[3].mxu0 }
  0xe1   :  { %96 = vst.msk [vmem:[#allocation2 + $0x8] sm:$0xff] %vm19_vm0, %v93_v10 }
  0xe6   :  { %v100_v13 = vld [vmem:[#allocation2] sm:$0xff] }
  0xe7   :  { %v109_v14 = vadd.f32 %v148_v12, %v100_v13 }
  0xe8   :  { %v101_v15 = vld [vmem:[#allocation2 + $0x8] sm:$0xff] }
  0xe9   :  { %v113_v16 = vmul.f32 0.044715, %v109_v14  ;;  %v110_v17 = vadd.f32 %v148_v12, %v101_v15  ;;  %v111_v28 = vmul.f32 0.5, %v109_v14 }
  0xeb   :  { %v115_v18 = vmul.f32 %v113_v16, %v109_v14  ;;  %v114_v19 = vmul.f32 0.044715, %v110_v17  ;;  %v112_v32 = vmul.f32 0.5, %v110_v17 }
  0xed   :  { %v117_v20 = vmul.f32 %v115_v18, %v109_v14  ;;  %v116_v21 = vmul.f32 %v114_v19, %v110_v17 }
  0xef   :  { %v119_v22 = vadd.f32 %v117_v20, %v109_v14  ;;  %v118_v23 = vmul.f32 %v116_v21, %v110_v17 }
  0xf1   :  { %v121_v24 = vmul.f32 0.7978846, %v119_v22  ;;  %v120_v25 = vadd.f32 %v118_v23, %v110_v17 }
  0xf3   :  { %169 = vtanh.f32 %v121_v24  ;;  %v122_v26 = vmul.f32 0.7978846, %v120_v25 }
  0xf5   :  { %171 = vtanh.f32 %v122_v26 }
  0xfd   :  { %v170_v27 = vpop.eup %169 }
  0xfe   :  { %v125_v29 = vadd.f32 1.0, %v170_v27 }
  0xff   :  { %v172_v30 = vpop.eup %171 }
 0x100   :  { %v127_v31 = vmul.f32 %v125_v29, %v111_v28  ;;  %v126_v33 = vadd.f32 1.0, %v172_v30 }
 0x102   :  { %v151_v34 = vpack.c.bf16 %v127_v31, %v127_v31  ;;  %v128_v35 = vmul.f32 %v126_v33, %v112_v32 }
 0x104   :  { %138 = vst.msk [vmem:[%s220_s3] sm:$0xf] %vm137_vm3, %v151_v34  ;;  %v152_v36 = vpack.c.bf16 %v128_v35, %v128_v35 }
 0x106   :  { %139 = vst.msk [vmem:[%s220_s3 + $0x4] sm:$0xf] %vm137_vm3, %v152_v36 }

// kernel: encoder_bert_forward.17
= control target key start
LH: loop header
LB: loop body
LE: loop exit
PB: predicated region body
PF: predicated region fallthrough
CT: control target
= control target key end

     0   :  { %vm28_vm0 = vcmask 261120   ;;  %v247_v0 = vmov 0.0   ;;  %vm248_vm1 = vmmov 0   ;;  %vm72_vm2 = vcmask 523264   ;;  %s325_s1 = inlined_call_operand.vmem [shape: bf16[64,32], index: 1, kind: input, shape index: {}]   ;;  %s326_s0 = inlined_call_operand.vmem [shape: bf16[16,64], index: 0, kind: input, shape index: {}]   ;;  %s327_s3 = inlined_call_operand.vmem [shape: bf16[16,32], index: 3, kind: input, shape index: {}]   ;;  %s328_s2 = inlined_call_operand.vmem [shape: f32[1,32], index: 2, kind: input, shape index: {}]   ;;  %s329_s4 = inlined_call_operand.vmem [shape: f32[1,32], index: 4, kind: input, shape index: {}]   ;;  %s330_s5 = inlined_call_operand.vmem [shape: f32[1,32], index: 5, kind: input, shape index: {}]   ;;  %s331_s6 = inlined_call_operand.vmem [shape: bf16[16,32], index: 6, kind: output, shape index: {}]  }
   0x1   :  { %224 = vmatprep.subr.bf16.mxu0 %v247_v0  ;;  %v238_v1 = vld [vmem:[%s325_s1] sm:$0xff]   ;;  %232 = vmatprep.mubr.msk.bf16.mxu0 %vm248_vm1, %v247_v0  ;;  %29 = vst.msk [vmem:[#allocation2] sm:$0xff] %vm28_vm0, %v247_v0  ;;  %30 = vst.msk [vmem:[#allocation2 + $0x8] sm:$0xff] %vm28_vm0, %v247_v0  ;;  %v239_v2 = vld [vmem:[%s325_s1 + $0x8] sm:$0xff]   ;;  %vm195_vm3 = vcmask 257024  }
   0x2   :  { %225 = vmatpush3.bf16.msra.mxu0 %v238_v1  ;;  %v240_v3 = vld [vmem:[%s325_s1 + $0x10] sm:$0xff]   ;;  %v241_v4 = vld [vmem:[%s325_s1 + $0x18] sm:$0xff]   ;;  %v242_v5 = vld [vmem:[%s326_s0] sm:$0xff]  }
   0x3   :  { %226 = vmatprep.subr.bf16.mxu0 %v247_v0  ;;  %v216_v14 = vld [vmem:[%s327_s3] sm:$0xff]  }
   0x4   :  { %v208_v15 = vld [vmem:[%s328_s2] ss:$0 sm:$0xff]  ;;  %v217_v16 = vunpack.c.l.bf16 %v216_v14  ;;  %v218_v19 = vunpack.c.h.bf16 %v216_v14 }
   0x5   :  { %v209_v43 = vld [vmem:[%s329_s4] ss:$0 sm:$0xff] }
   0x6   :  { %227 = vmatpush3.bf16.msra.mxu0 %v239_v2  ;;  %v210_v45 = vld [vmem:[%s330_s5] ss:$0 sm:$0xff] }
   0x7   :  { %228 = vmatprep.subr.bf16.mxu0 %v247_v0 }
   0x8   :  { %v31_v6 = vld [vmem:[#allocation2] sm:$0xff]  ;;  %v32_v8 = vld [vmem:[#allocation2 + $0x8] sm:$0xff] }
   0xa   :  { %229 = vmatpush3.bf16.msra.mxu0 %v240_v3 }
   0xb   :  { %230 = vmatprep.subr.bf16.mxu0 %v247_v0 }
   0xe   :  { %231 = vmatpush3.bf16.msra.mxu0 %v241_v4 }
  0x11   :  { %233 = vmatmul.mubr.msk.bf16.vlgmr.msra.gmra.mrb[0].mxu0 %vm72_vm2, %v242_v5 }
  0xe4   :  { %v110_v7 = vpop.f32.mrb[0].mxu0 }
  0xe5   :  { %v117_v9 = vadd.f32 %v110_v7, %v31_v6  ;;  %v234_v10 = vpop.f32.mrb[1].mxu0 }
  0xe6   :  { %v113_v11 = vpop.f32.mrb[2].mxu0 }
  0xe7   :  { %120 = vst.msk [vmem:[#allocation2] sm:$0xff] %vm28_vm0, %v117_v9  ;;  %v118_v12 = vadd.f32 %v113_v11, %v32_v8  ;;  %v235_v13 = vpop.f32.mrb[3].mxu0 }
  0xe9   :  { %121 = vst.msk [vmem:[#allocation2 + $0x8] sm:$0xff] %vm28_vm0, %v118_v12 }
  0xee   :  { %v125_v17 = vld [vmem:[#allocation2] sm:$0xff] }
  0xef   :  { %v134_v18 = vadd.f32 %v208_v15, %v125_v17 }
  0xf0   :  { %v126_v20 = vld [vmem:[#allocation2 + $0x8] sm:$0xff] }
  0xf1   :  { %v140_v21 = vadd.f32 %v217_v16, %v134_v18  ;;  %v135_v22 = vadd.f32 %v208_v15, %v126_v20 }
  0xf3   :  { %v142_v23 = vsel %vm28_vm0, %v140_v21, 0.0  ;;  %v141_v24 = vadd.f32 %v218_v19, %v135_v22 }
  0xf4   :  { %143 = vadd.xlane.f32.xlu0 %v142_v23 }
  0xf5   :  { %v145_v25 = vsel %vm28_vm0, %v141_v24, 0.0 }
  0xf8   :  { %146 = vadd.xlane.f32.xlu0 %v145_v25 }
 0x181   :  { %v144_v26 = vpop.xlane.xlu0 %143 }
 0x182   :  { %v149_v27 = vmul.f32 0.03125, %v144_v26 }
 0x184   :  { %v151_v28 = vsub.f32 %v140_v21, %v149_v27 }
 0x185   :  { %v147_v29 = vpop.xlane.xlu0 %146 }
 0x186   :  { %v150_v30 = vmul.f32 0.03125, %v147_v29  ;;  %v153_v31 = vmul.f32 %v151_v28, %v151_v28 }
 0x188   :  { %v152_v32 = vsub.f32 %v141_v24, %v150_v30  ;;  %v155_v33 = vsel %vm28_vm0, %v153_v31, 0.0 }
 0x189   :  { %156 = vadd.xlane.f32.xlu1 %v155_v33 }
 0x18a   :  { %v154_v34 = vmul.f32 %v152_v32, %v152_v32 }
 0x18c   :  { %v158_v35 = vsel %vm28_vm0, %v154_v34, 0.0 }
 0x18d   :  { %159 = vadd.xlane.f32.xlu1 %v158_v35 }
 0x216   :  { %v157_v36 = vpop.xlane.xlu1 %156 }
 0x217   :  { %v161_v37 = vmul.f32 0.03125, %v157_v36 }
 0x219   :  { %v163_v38 = vadd.f32 1e-12, %v161_v37 }
 0x21a   :  { %v160_v39 = vpop.xlane.xlu1 %159 }
 0x21b   :  { %243 = vrsqrt.f32 %v163_v38  ;;  %v162_v40 = vmul.f32 0.03125, %v160_v39 }
 0x21d   :  { %v164_v41 = vadd.f32 1e-12, %v162_v40 }
 0x21f   :  { %245 = vrsqrt.f32 %v164_v41 }
 0x225   :  { %v244_v42 = vpop.eup %243 }
 0x226   :  { %v167_v44 = vmul.f32 %v244_v42, %v151_v28 }
 0x228   :  { %v176_v46 = vmul.f32 %v209_v43, %v167_v44 }
 0x229   :  { %v246_v47 = vpop.eup %245 }
 0x22a   :  { %v185_v48 = vadd.f32 %v210_v45, %v176_v46  ;;  %v168_v49 = vmul.f32 %v246_v47, %v152_v32 }
 0x22c   :  { %v213_v50 = vpack.c.bf16 %v185_v48, %v185_v48  ;;  %v177_v51 = vmul.f32 %v209_v43, %v168_v49 }
 0x22e   :  { %196 = vst.msk [vmem:[%s331_s6] sm:$0xf] %vm195_vm3, %v213_v50  ;;  %v186_v52 = vadd.f32 %v210_v45, %v177_v51 }
 0x230   :  { %v214_v53 = vpack.c.bf16 %v186_v52, %v186_v52 }
 0x232   :  { %197 = vst.msk [vmem:[%s331_s6 + $0x4] sm:$0xf] %vm195_vm3, %v214_v53 }

// kernel: encoder_bert_forward.23
= control target key start
LH: loop header
LB: loop body
LE: loop exit
PB: predicated region body
PF: predicated region fallthrough
CT: control target
= control target key end

     0   :  { %v161_v1 = vmov 0.0   ;;  %vm162_vm0 = vmmov 0   ;;  %vm20_vm1 = vcmask 254976   ;;  %s211_s0 = inlined_call_operand.vmem [shape: bf16[2,32], index: 0, kind: input, shape index: {}]   ;;  %s212_s1 = inlined_call_operand.vmem [shape: bf16[32,32], index: 1, kind: input, shape index: {}]   ;;  %s213_s2 = inlined_call_operand.vmem [shape: f32[1,32], index: 2, kind: input, shape index: {}]   ;;  %s214_s3 = inlined_call_operand.hbm [shape: f32[2,32], index: 3, kind: output, shape index: {}]  }
   0x1   :  { %v133_v0 = vld [vmem:[%s212_s1] sm:$0xff]   ;;  %122 = vmatprep.subr.bf16.mxu0 %v161_v1  ;;  %v134_v2 = vld [vmem:[%s212_s1 + $0x8] sm:$0xff]   ;;  %126 = vmatprep.mubr.msk.bf16.mxu0 %vm162_vm0, %v161_v1 }
   0x2   :  { %123 = vmatpush3.bf16.msra.mxu0 %v133_v0 }
   0x3   :  { %8 = vsyncpa [#allocation4], 0  ;;  %124 = vmatprep.subr.bf16.mxu0 %v161_v1  ;;  %21 = vst.msk [vmem:[#allocation2] sm:$0x3] %vm20_vm1, %v161_v1  ;;  %v23_v3 = vld [vmem:[%s211_s0] sm:$0x1] }
   0x4   :  { %vm40_vm2 = vcmask 261120   ;;  %v118_v10 = vld [vmem:[%s213_s2] ss:$0 sm:$0xff]  ;;  %s163_s19 = smov [#allocation3]  }
   0x5   :  { %s107_s20 = sshll.u32 %s163_s19, 4  ;;  %s108_s20 = int_to_ptr.vmem [resolvable:$true] %s107_s20 }
   0x6   :  { %125 = vmatpush3.bf16.msra.mxu0 %v134_v2  ;;  %s137_s0 = scalar_lea.vmem %s108_s20, 32  ;;  %p142_p1 = scmp.lt.s32.totalorder %s108_s20, %s108_s20 }
   0x7   :  { %p138_p0 = scmp.ne.s32.totalorder %s108_s20, %s137_s0  ;;  %p143_p2 = scmp.lt.s32.totalorder %s137_s0, %s137_s0 }
   0x9   :  { %127 = vmatmul.mubr.msk.bf16.vlgmr.msra.gmra.mrb[0].mxu0 %vm40_vm2, %v23_v3  ;;  %p144_p3 = por %p143_p2, %p142_p1 }
   0xa   :  { %v22_v4 = vld [vmem:[#allocation2] sm:$0x3] }
   0xb   :  { %p145_p4 = pnand %p144_p3, %p138_p0 }
  0xdc   :  { %v78_v5 = vpop.f32.mrb[0].mxu0 }
  0xdd   :  { %v84_v6 = vadd.f32 %v78_v5, %v22_v4  ;;  %v128_v7 = vpop.f32.mrb[1].mxu0 }
  0xde   :  { %v81_v8 = vpop.f32.mrb[2].mxu0 }
  0xdf   :  { %86 = vst.msk [vmem:[#allocation2] sm:$0x3] %vm20_vm1, %v84_v6  ;;  %v129_v9 = vpop.f32.mrb[3].mxu0 }
  0xe6   :  { %v90_v11 = vld [vmem:[#allocation2] sm:$0x3] }
  0xe7   :  { %v98_v12 = vadd.f32 %v118_v10, %v90_v11 }
  0xe9   :  { %135 = vtanh.f32 %v98_v12 }
  0xf3   :  { %v136_v13 = vpop.eup %135 }
  0xf4   :  { %100 = vst.msk [vmem:[#allocation3] sm:$0x3] %vm20_vm1, %v136_v13 }
  0xf5   :  { %148 = shalt.err (!%p145_p4)
}
  0xf6   :  { %s149_s2 = scalar_lea.hbm %s214_s3, 32 }
  0xf7   :  { %p150_p5 = scmp.ne.s32.totalorder %s214_s3, %s149_s2  ;;  %p153_p6 = scmp.lt.u32.totalorder %s149_s2, %s214_s3 }
  0xf9   :  { %p155_p7 = pnand %p153_p6, %p150_p5 }
  0xfb   :  { %158 = shalt.err (!%p155_p7)
}
  0xfc   :  { %110 = dma.vmem_to_hbm [thread:$0]  %s108_s20, 32, %s214_s3, [#allocation4]  }
  0xfd   :  { %159 = dma.done.wait [#allocation4], 32  }
  0xfe   :  { %160 = vsyncadd [#allocation4], 4294967264 }
  0xff   :  { %114 = vsyncpa [#allocation4], 1 }

</bundles_post_ra>
